<compile_context>
chip_gen: v7x
topology: tpu7x:2x2x1
jax: 0.10.0
libtpu: 0.0.40
codegen_flags: <defaults>
</compile_context>

<pallas_src>
import functools

import jax
import jax.numpy as jnp
import numpy as np
from jax.experimental import pallas as pl
from jax.experimental.pallas import tpu as pltpu


def _stem_kernel(x_ref, w1_ref, w2_ref, b1_ref, b2_ref, o_ref,
                 stack1_ref, stack2_ref, *, wo2, cin, cmid):
    """Fused Stem for one image.

    x_ref      : (4, 4, Cin, M2)   4x4 phase-split input (operand dtype),
                 x_ref[pr, pc, c, i*wo2 + j] = x[c, 4i + pr, 4j + pc]
    w1_ref     : (Cmid, 9*Cin)     stage-1 weights, BN scale folded,
                 column order (kh, kw, cin)
    w2_ref     : (Cout, 9*Cmid)    stage-2 weights, BN scale folded
    b1_ref/b2_ref : (C, 1) f32     folded BN + conv bias
    o_ref      : (Cout, M2)        rows = channels, lanes = flat (i, j)
    stack1_ref : (9*Cin,  M2)      VMEM scratch: stacked shifted input slabs
    stack2_ref : (9*Cmid, M2)      VMEM scratch: stacked shifted stage-1 slabs
    """
    m2 = o_ref.shape[-1]
    f32 = jnp.float32
    op_dtype = x_ref.dtype

    # Lanes = flattened coarse grid (l = i*wo2 + j, j fastest). col_ok kills the
    # j == 0 lanes whenever a tap reads column j - 1 (left zero padding).
    lane = jax.lax.broadcasted_iota(jnp.int32, (1, m2), 1)
    col_ok = (lane % wo2) != 0

    zeros_cache = {}

    def zblock(c, s, dtype):
        key = (c, s, jnp.dtype(dtype).name)
        if key not in zeros_cache:                 # hoist: build each pad once
            zeros_cache[key] = jnp.zeros((c, s), dtype)
        return zeros_cache[key]

    def shift_slab(ph, di, dj):
        # ph: (C, M2). Returns t with t[:, i*wo2+j] = ph[:, (i+di)*wo2+(j+dj)]
        # and 0 where i+di < 0 or j+dj < 0 (di, dj in {-1, 0}) -> zero padding.
        s = (-di) * wo2 + (-dj)
        if s == 0:
            return ph
        t = jnp.concatenate(
            [zblock(ph.shape[0], s, ph.dtype), ph[:, :m2 - s]], axis=1)
        if dj:
            t = jnp.where(col_ok, t, jnp.zeros_like(t))
        return t

    def tap(parity, k, nphase):
        # 3x3 / stride-2 / pad-1 conv whose input is split into `nphase` parity
        # phases along this axis: (output parity, kernel offset k) ->
        # (input phase index, coarse shift in {-1, 0}).
        d = (nphase // 2) * parity + k - 1
        return (nphase - 1, -1) if d < 0 else (d, 0)

    # ---- stage 1: Conv3x3/s2/p1 (BN scale pre-folded) + bias + GELU ---------
    # One MXU dot (K = 9*Cin) per stage-1 output parity (rp, cp); the result is
    # already 2x2 phase-split in VMEM for stage 2 -- no HBM intermediate.
    memo = {}

    def s1_slab(pr, pc, di, dj):
        key = (pr, pc, di, dj)
        if key not in memo:                         # 25 unique of 36 uses
            memo[key] = shift_slab(x_ref[pr, pc], di, dj)
        return memo[key]

    h = {}
    for rp in (0, 1):
        for cp in (0, 1):
            for kh in range(3):
                pr, di = tap(rp, kh, 4)
                for kw in range(3):
                    pc, dj = tap(cp, kw, 4)
                    t = kh * 3 + kw
                    stack1_ref[pl.ds(t * cin, cin), :] = s1_slab(pr, pc, di, dj)
            a = jnp.dot(w1_ref[...], stack1_ref[...],
                        preferred_element_type=f32) + b1_ref[...]
            # act_layer: GELU(tanh); keep f32, cast once for the stage-2 MXU.
            h[(rp, cp)] = jax.nn.gelu(a, approximate=True).astype(op_dtype)

    # ---- stage 2: Conv3x3/s2/p1 (BN scale pre-folded) + bias ----------------
    for kh in range(3):
        rp, di = tap(0, kh, 2)
        for kw in range(3):
            cp, dj = tap(0, kw, 2)
            t = kh * 3 + kw
            stack2_ref[pl.ds(t * cmid, cmid), :] = shift_slab(h[(rp, cp)], di, dj)
    out = jnp.dot(w2_ref[...], stack2_ref[...],
                  preferred_element_type=f32) + b2_ref[...]
    o_ref[...] = out.astype(o_ref.dtype)


def _vmem_capacity_bytes():
    try:
        cap = getattr(pltpu.get_tpu_info(), "vmem_capacity_bytes", None)
        if cap:
            return int(cap)
    except Exception:
        pass
    return 64 * 2 ** 20      # conservative fallback: v7x per-TensorCore VMEM


@functools.partial(jax.jit, static_argnames=("operand_dtype",))
def stem_forward(x_nchw, p, eps=1e-5, operand_dtype=jnp.bfloat16):
    n, cin, hh, ww = x_nchw.shape
    if hh % 4 or ww % 4:
        # TODO(synk): PyTorch Conv2d(3,2,1) supports odd sizes (ceil(H/2)); not here.
        raise ValueError("H and W must be multiples of 4")
    ho2, wo2 = hh // 4, ww // 4
    m2 = ho2 * wo2
    cmid = p["w1"].shape[0]
    cout = p["w2"].shape[0]
    out_dtype = x_nchw.dtype

    # 4x4 phase split, channel-major: xph[n,pr,pc,c,i*wo2+j] = x[n,c,4i+pr,4j+pc]
    xph = x_nchw.reshape(n, cin, ho2, 4, wo2, 4)
    xph = jnp.transpose(xph, (0, 3, 5, 1, 2, 4)).reshape(n, 4, 4, cin, m2)
    xph = xph.astype(operand_dtype)                 # cast once, wrapper-side

    # Fold BatchNorm (eval, running stats) scale into the conv weights and the
    # conv bias + BN shift into a single per-channel bias (kept in f32).
    s1 = p["gamma1"] * jax.lax.rsqrt(p["var1"] + eps)
    s2 = p["gamma2"] * jax.lax.rsqrt(p["var2"] + eps)
    b1 = (p["beta1"] + s1 * (p["b1"] - p["mean1"])).reshape(cmid, 1)
    b2 = (p["beta2"] + s2 * (p["b2"] - p["mean2"])).reshape(cout, 1)

    # Weights as (Cout, 9*Cin) with column order (kh, kw, cin) to match the
    # in-kernel sublane stacking of the 9 shifted tap slabs. BN scale folded.
    w1f = (jnp.transpose(p["w1"], (0, 2, 3, 1)).reshape(cmid, 9 * cin)
           * s1[:, None]).astype(operand_dtype)
    w2f = (jnp.transpose(p["w2"], (0, 2, 3, 1)).reshape(cout, 9 * cmid)
           * s2[:, None]).astype(operand_dtype)

    # VMEM budget: real element sizes, x2 for double-buffered grid blocks, plus
    # stack scratches and live in-kernel slabs; capped by actual device VMEM.
    ob = jnp.dtype(operand_dtype).itemsize
    outb = jnp.dtype(out_dtype).itemsize
    blk = 16 * cin * m2 * ob + cout * m2 * outb               # in/out blocks
    wgt = (cmid * 9 * cin + cout * 9 * cmid) * ob + (cmid + cout) * 4
    scratch = (9 * cin + 9 * cmid) * m2 * ob
    live = (25 * cin + 4 * cmid) * m2 * ob + (2 * cmid + 2 * cout) * m2 * 4
    need = 2 * (blk + wgt) + scratch + live
    vmem_limit = int(min(0.75 * _vmem_capacity_bytes(),
                         max(1.5 * need, 16 * 2 ** 20)))

    kernel = functools.partial(_stem_kernel, wo2=wo2, cin=cin, cmid=cmid)

    out = pl.pallas_call(
        kernel,
        out_shape=jax.ShapeDtypeStruct((n, cout, m2), out_dtype),
        grid=(n,),
        in_specs=[
            pl.BlockSpec((None, 4, 4, cin, m2), lambda i: (i, 0, 0, 0, 0)),
            pl.BlockSpec((cmid, 9 * cin), lambda i: (0, 0)),
            pl.BlockSpec((cout, 9 * cmid), lambda i: (0, 0)),
            pl.BlockSpec((cmid, 1), lambda i: (0, 0)),
            pl.BlockSpec((cout, 1), lambda i: (0, 0)),
        ],
        out_specs=pl.BlockSpec((None, cout, m2), lambda i: (i, 0, 0)),
        scratch_shapes=[
            pltpu.VMEM((9 * cin, m2), operand_dtype),
            pltpu.VMEM((9 * cmid, m2), operand_dtype),
        ],
        compiler_params=pltpu.CompilerParams(
            dimension_semantics=("parallel",),
            vmem_limit_bytes=vmem_limit),
    )(xph, w1f, w2f, b1, b2)

    # Rows are already channels, lanes are flat (h, w) -> NCHW via free reshape.
    return out.reshape(n, cout, ho2, wo2)


def init_stem_params(key, in_channels, out_channels, ratio=0.5):
    mid = int(out_channels * ratio)
    ks = jax.random.split(key, 12)
    return {
        "w1": 0.1 * jax.random.normal(ks[0], (mid, in_channels, 3, 3), jnp.float32),
        "b1": 0.05 * jax.random.normal(ks[1], (mid,), jnp.float32),
        "gamma1": 1.0 + 0.1 * jax.random.normal(ks[2], (mid,), jnp.float32),
        "beta1": 0.05 * jax.random.normal(ks[3], (mid,), jnp.float32),
        "mean1": 0.1 * jax.random.normal(ks[4], (mid,), jnp.float32),
        "var1": 1.0 + 0.1 * jnp.abs(jax.random.normal(ks[5], (mid,), jnp.float32)),
        "w2": 0.1 * jax.random.normal(ks[6], (out_channels, mid, 3, 3), jnp.float32),
        "b2": 0.05 * jax.random.normal(ks[7], (out_channels,), jnp.float32),
        "gamma2": 1.0 + 0.1 * jax.random.normal(ks[8], (out_channels,), jnp.float32),
        "beta2": 0.05 * jax.random.normal(ks[9], (out_channels,), jnp.float32),
        "mean2": 0.1 * jax.random.normal(ks[10], (out_channels,), jnp.float32),
        "var2": 1.0 + 0.1 * jnp.abs(jax.random.normal(ks[11], (out_channels,), jnp.float32)),
    }


# --- pure-JAX reference (XLA conv) for a correctness cross-check -------------
def _ref_stage(x_nhwc, weight, bias, gamma, beta, mean, var, eps, apply_act):
    w_hwio = jnp.transpose(weight, (2, 3, 1, 0))
    y = jax.lax.conv_general_dilated(
        x_nhwc, w_hwio, window_strides=(2, 2), padding=((1, 1), (1, 1)),
        dimension_numbers=("NHWC", "HWIO", "NHWC"))
    scale = gamma / jnp.sqrt(var + eps)
    y = y * scale + (beta + scale * (bias - mean))
    if apply_act:
        y = jax.nn.gelu(y, approximate=True)
    return y


def stem_reference(x_nchw, p, eps=1e-5):
    x = jnp.transpose(x_nchw, (0, 2, 3, 1))
    h = _ref_stage(x, p["w1"], p["b1"], p["gamma1"], p["beta1"],
                   p["mean1"], p["var1"], eps, apply_act=True)
    o = _ref_stage(h, p["w2"], p["b2"], p["gamma2"], p["beta2"],
                   p["mean2"], p["var2"], eps, apply_act=False)
    return jnp.transpose(o, (0, 3, 1, 2))


if __name__ == "__main__":
    key = jax.random.PRNGKey(0)
    kx, kp = jax.random.split(key)

    # Stem(in_channels=4, out_channels=32, img_size=16, ratio=0.5), batch=2
    in_channels, out_channels, img_size, batch = 4, 32, 16, 2
    x = jax.random.normal(kx, (batch, in_channels, img_size, img_size), jnp.float32)
    params = init_stem_params(kp, in_channels, out_channels, ratio=0.5)

    ref = jax.block_until_ready(stem_reference(x, params))

    # f32 operand path: mathematically identical to the reference (tight tol).
    out_f32 = jax.block_until_ready(
        stem_forward(x, params, operand_dtype=jnp.float32))
    assert out_f32.shape == (batch, out_channels, img_size // 4, img_size // 4)
    np.testing.assert_allclose(np.asarray(out_f32), np.asarray(ref),
                               rtol=2e-3, atol=2e-3)

    # Default bf16-operand path (v6e/v7x throughput, halved input DMA):
    # f32 accumulation / bias / GELU, checked with a loose tolerance.
    out_bf16 = jax.block_until_ready(stem_forward(x, params))
    np.testing.assert_allclose(np.asarray(out_bf16), np.asarray(ref),
                               rtol=5e-2, atol=5e-2)

    print("KERNEL_OK")
</pallas_src>

<mosaic_0001>
module attributes {stable_mosaic.version = 11 : i64} {
  func.func @_stem_kernel(%arg0: i32, %arg1: memref<1x4x4x4x16xf32, #tpu.memory_space<vmem>>, %arg2: memref<16x36xf32, #tpu.memory_space<vmem>>, %arg3: memref<32x144xf32, #tpu.memory_space<vmem>>, %arg4: memref<16x1xf32, #tpu.memory_space<vmem>>, %arg5: memref<32x1xf32, #tpu.memory_space<vmem>>, %arg6: memref<1x32x16xf32, #tpu.memory_space<vmem>>, %arg7: memref<36x16xf32, #tpu.memory_space<vmem>>, %arg8: memref<144x16xf32, #tpu.memory_space<vmem>>) attributes {dimension_semantics = [#tpu.dimension_semantics<parallel>], iteration_bounds = array<i64: 2>, scalar_prefetch = 0 : i64, scratch_operands = 2 : i64, tpu.core_type = #tpu.core_type<tc>, window_params = [{transform_indices = @transform_0, window_bounds = array<i64: 1, 4, 4, 4, 16>}, {pipeline_mode = #tpu.pipeline_mode<synchronous>, transform_indices = @transform_1, window_bounds = array<i64: 16, 36>}, {pipeline_mode = #tpu.pipeline_mode<synchronous>, transform_indices = @transform_2, window_bounds = array<i64: 32, 144>}, {pipeline_mode = #tpu.pipeline_mode<synchronous>, transform_indices = @transform_3, window_bounds = array<i64: 16, 1>}, {pipeline_mode = #tpu.pipeline_mode<synchronous>, transform_indices = @transform_4, window_bounds = array<i64: 32, 1>}, {transform_indices = @transform_5, window_bounds = array<i64: 1, 32, 16>}]} {
    %0 = tpu.iota {dimensions = array<i32: 1>} : vector<1x16xi32>
    %c4_i32 = arith.constant 4 : i32
    %c0_i32 = arith.constant 0 : i32
    %1 = arith.cmpi eq, %c4_i32, %c0_i32 : i32
    %c1_i32 = arith.constant 1 : i32
    %2 = arith.select %1, %c1_i32, %c4_i32 : i32
    %3 = vector.broadcast %2 : i32 to vector<1x16xi32>
    %4 = arith.remsi %0, %3 : vector<1x16xi32>
    %c0_i32_0 = arith.constant 0 : i32
    %5 = vector.broadcast %c0_i32_0 : i32 to vector<1x16xi32>
    %6 = arith.cmpi ne, %4, %5 : vector<1x16xi32>
    %c0_i32_1 = arith.constant 0 : i32
    %7 = vector.broadcast %c0_i32_1 : i32 to vector<1x16xi32>
    %8 = arith.cmpi slt, %4, %7 : vector<1x16xi32>
    %c0_i32_2 = arith.constant 0 : i32
    %9 = arith.cmpi slt, %2, %c0_i32_2 : i32
    %10 = vector.broadcast %9 : i1 to vector<1x16xi1>
    %11 = vector.broadcast %10 : vector<1x16xi1> to vector<1x16xi1>
    %12 = arith.xori %8, %11 : vector<1x16xi1>
    %13 = arith.andi %12, %6 : vector<1x16xi1>
    %14 = vector.broadcast %2 : i32 to vector<1x16xi32>
    %15 = arith.addi %4, %14 : vector<1x16xi32>
    %16 = arith.select %13, %15, %4 : vector<1x16xi1>, vector<1x16xi32>
    %c0_i32_3 = arith.constant 0 : i32
    %17 = vector.broadcast %c0_i32_3 : i32 to vector<1x16xi32>
    %18 = arith.cmpi ne, %16, %17 : vector<1x16xi32>
    %c0 = arith.constant 0 : index
    %c3 = arith.constant 3 : index
    %c3_4 = arith.constant 3 : index
    %c0_5 = arith.constant 0 : index
    %c0_6 = arith.constant 0 : index
    %19 = vector.load %arg1[%c0, %c3, %c3_4, %c0_5, %c0_6] : memref<1x4x4x4x16xf32, #tpu.memory_space<vmem>>, vector<1x1x1x4x16xf32>
    %20 = vector.shape_cast %19 : vector<1x1x1x4x16xf32> to vector<4x16xf32>
    %cst = arith.constant 0.000000e+00 : f32
    %21 = vector.broadcast %cst : f32 to vector<4x5xf32>
    %22 = vector.extract_strided_slice %20 {offsets = [0, 0], sizes = [4, 11], strides = [1, 1]} : vector<4x16xf32> to vector<4x11xf32>
    %23 = tpu.concatenate %21, %22 in 1 : vector<4x5xf32>, vector<4x11xf32> -> vector<4x16xf32>
    %cst_7 = arith.constant 0.000000e+00 : f32
    %24 = vector.broadcast %cst_7 : f32 to vector<4x16xf32>
    %25 = vector.shape_cast %18 : vector<1x16xi1> to vector<1x16xi1>
    %26 = vector.broadcast %25 : vector<1x16xi1> to vector<4x16xi1>
    %27 = arith.select %26, %23, %24 : vector<4x16xi1>, vector<4x16xf32>
    %c0_8 = arith.constant 0 : index
    %c0_9 = arith.constant 0 : index
    %28 = vector.load %arg7[%c0_8, %c0_9] : memref<36x16xf32, #tpu.memory_space<vmem>>, vector<4x16xf32>
    tpu.vector_store %arg7[%c0_8, %c0_9], %27 {strides = array<i32>} : memref<36x16xf32, #tpu.memory_space<vmem>>, vector<4x16xf32>,
    %c0_10 = arith.constant 0 : index
    %c3_11 = arith.constant 3 : index
    %c0_12 = arith.constant 0 : index
    %c0_13 = arith.constant 0 : index
    %c0_14 = arith.constant 0 : index
    %29 = vector.load %arg1[%c0_10, %c3_11, %c0_12, %c0_13, %c0_14] : memref<1x4x4x4x16xf32, #tpu.memory_space<vmem>>, vector<1x1x1x4x16xf32>
    %30 = vector.shape_cast %29 : vector<1x1x1x4x16xf32> to vector<4x16xf32>
    %cst_15 = arith.constant 0.000000e+00 : f32
    %31 = vector.broadcast %cst_15 : f32 to vector<4x4xf32>
    %32 = vector.extract_strided_slice %30 {offsets = [0, 0], sizes = [4, 12], strides = [1, 1]} : vector<4x16xf32> to vector<4x12xf32>
    %33 = tpu.concatenate %31, %32 in 1 : vector<4x4xf32>, vector<4x12xf32> -> vector<4x16xf32>
    %c4 = arith.constant 4 : index
    %c0_16 = arith.constant 0 : index
    %34 = vector.load %arg7[%c4, %c0_16] : memref<36x16xf32, #tpu.memory_space<vmem>>, vector<4x16xf32>
    tpu.vector_store %arg7[%c4, %c0_16], %33 {strides = array<i32>} : memref<36x16xf32, #tpu.memory_space<vmem>>, vector<4x16xf32>,
    %c0_17 = arith.constant 0 : index
    %c3_18 = arith.constant 3 : index
    %c1 = arith.constant 1 : index
    %c0_19 = arith.constant 0 : index
    %c0_20 = arith.constant 0 : index
    %35 = vector.load %arg1[%c0_17, %c3_18, %c1, %c0_19, %c0_20] : memref<1x4x4x4x16xf32, #tpu.memory_space<vmem>>, vector<1x1x1x4x16xf32>
    %36 = vector.shape_cast %35 : vector<1x1x1x4x16xf32> to vector<4x16xf32>
    %37 = vector.extract_strided_slice %36 {offsets = [0, 0], sizes = [4, 12], strides = [1, 1]} : vector<4x16xf32> to vector<4x12xf32>
    %38 = tpu.concatenate %31, %37 in 1 : vector<4x4xf32>, vector<4x12xf32> -> vector<4x16xf32>
    %c8 = arith.constant 8 : index
    %c0_21 = arith.constant 0 : index
    %39 = vector.load %arg7[%c8, %c0_21] : memref<36x16xf32, #tpu.memory_space<vmem>>, vector<4x16xf32>
    tpu.vector_store %arg7[%c8, %c0_21], %38 {strides = array<i32>} : memref<36x16xf32, #tpu.memory_space<vmem>>, vector<4x16xf32>,
    %c0_22 = arith.constant 0 : index
    %c0_23 = arith.constant 0 : index
    %c3_24 = arith.constant 3 : index
    %c0_25 = arith.constant 0 : index
    %c0_26 = arith.constant 0 : index
    %40 = vector.load %arg1[%c0_22, %c0_23, %c3_24, %c0_25, %c0_26] : memref<1x4x4x4x16xf32, #tpu.memory_space<vmem>>, vector<1x1x1x4x16xf32>
    %41 = vector.shape_cast %40 : vector<1x1x1x4x16xf32> to vector<4x16xf32>
    %cst_27 = arith.constant 0.000000e+00 : f32
    %42 = vector.broadcast %cst_27 : f32 to vector<4x1xf32>
    %43 = vector.extract_strided_slice %41 {offsets = [0, 0], sizes = [4, 15], strides = [1, 1]} : vector<4x16xf32> to vector<4x15xf32>
    %44 = tpu.concatenate %42, %43 in 1 : vector<4x1xf32>, vector<4x15xf32> -> vector<4x16xf32>
    %cst_28 = arith.constant 0.000000e+00 : f32
    %45 = vector.broadcast %cst_28 : f32 to vector<4x16xf32>
    %46 = vector.shape_cast %18 : vector<1x16xi1> to vector<1x16xi1>
    %47 = vector.broadcast %46 : vector<1x16xi1> to vector<4x16xi1>
    %48 = arith.select %47, %44, %45 : vector<4x16xi1>, vector<4x16xf32>
    %c12 = arith.constant 12 : index
    %c0_29 = arith.constant 0 : index
    %49 = vector.load %arg7[%c12, %c0_29] : memref<36x16xf32, #tpu.memory_space<vmem>>, vector<4x16xf32>
    tpu.vector_store %arg7[%c12, %c0_29], %48 {strides = array<i32>} : memref<36x16xf32, #tpu.memory_space<vmem>>, vector<4x16xf32>,
    %c0_30 = arith.constant 0 : index
    %c0_31 = arith.constant 0 : index
    %c0_32 = arith.constant 0 : index
    %c0_33 = arith.constant 0 : index
    %c0_34 = arith.constant 0 : index
    %50 = vector.load %arg1[%c0_30, %c0_31, %c0_32, %c0_33, %c0_34] : memref<1x4x4x4x16xf32, #tpu.memory_space<vmem>>, vector<1x1x1x4x16xf32>
    %51 = vector.shape_cast %50 : vector<1x1x1x4x16xf32> to vector<4x16xf32>
    %c16 = arith.constant 16 : index
    %c0_35 = arith.constant 0 : index
    %52 = vector.load %arg7[%c16, %c0_35] : memref<36x16xf32, #tpu.memory_space<vmem>>, vector<4x16xf32>
    tpu.vector_store %arg7[%c16, %c0_35], %51 {strides = array<i32>} : memref<36x16xf32, #tpu.memory_space<vmem>>, vector<4x16xf32>,
    %c0_36 = arith.constant 0 : index
    %c0_37 = arith.constant 0 : index
    %c1_38 = arith.constant 1 : index
    %c0_39 = arith.constant 0 : index
    %c0_40 = arith.constant 0 : index
    %53 = vector.load %arg1[%c0_36, %c0_37, %c1_38, %c0_39, %c0_40] : memref<1x4x4x4x16xf32, #tpu.memory_space<vmem>>, vector<1x1x1x4x16xf32>
    %54 = vector.shape_cast %53 : vector<1x1x1x4x16xf32> to vector<4x16xf32>
    %c20 = arith.constant 20 : index
    %c0_41 = arith.constant 0 : index
    %55 = vector.load %arg7[%c20, %c0_41] : memref<36x16xf32, #tpu.memory_space<vmem>>, vector<4x16xf32>
    tpu.vector_store %arg7[%c20, %c0_41], %54 {strides = array<i32>} : memref<36x16xf32, #tpu.memory_space<vmem>>, vector<4x16xf32>,
    %c0_42 = arith.constant 0 : index
    %c1_43 = arith.constant 1 : index
    %c3_44 = arith.constant 3 : index
    %c0_45 = arith.constant 0 : index
    %c0_46 = arith.constant 0 : index
    %56 = vector.load %arg1[%c0_42, %c1_43, %c3_44, %c0_45, %c0_46] : memref<1x4x4x4x16xf32, #tpu.memory_space<vmem>>, vector<1x1x1x4x16xf32>
    %57 = vector.shape_cast %56 : vector<1x1x1x4x16xf32> to vector<4x16xf32>
    %58 = vector.extract_strided_slice %57 {offsets = [0, 0], sizes = [4, 15], strides = [1, 1]} : vector<4x16xf32> to vector<4x15xf32>
    %59 = tpu.concatenate %42, %58 in 1 : vector<4x1xf32>, vector<4x15xf32> -> vector<4x16xf32>
    %cst_47 = arith.constant 0.000000e+00 : f32
    %60 = vector.broadcast %cst_47 : f32 to vector<4x16xf32>
    %61 = vector.shape_cast %18 : vector<1x16xi1> to vector<1x16xi1>
    %62 = vector.broadcast %61 : vector<1x16xi1> to vector<4x16xi1>
    %63 = arith.select %62, %59, %60 : vector<4x16xi1>, vector<4x16xf32>
    %c24 = arith.constant 24 : index
    %c0_48 = arith.constant 0 : index
    %64 = vector.load %arg7[%c24, %c0_48] : memref<36x16xf32, #tpu.memory_space<vmem>>, vector<4x16xf32>
    tpu.vector_store %arg7[%c24, %c0_48], %63 {strides = array<i32>} : memref<36x16xf32, #tpu.memory_space<vmem>>, vector<4x16xf32>,
    %c0_49 = arith.constant 0 : index
    %c1_50 = arith.constant 1 : index
    %c0_51 = arith.constant 0 : index
    %c0_52 = arith.constant 0 : index
    %c0_53 = arith.constant 0 : index
    %65 = vector.load %arg1[%c0_49, %c1_50, %c0_51, %c0_52, %c0_53] : memref<1x4x4x4x16xf32, #tpu.memory_space<vmem>>, vector<1x1x1x4x16xf32>
    %66 = vector.shape_cast %65 : vector<1x1x1x4x16xf32> to vector<4x16xf32>
    %c28 = arith.constant 28 : index
    %c0_54 = arith.constant 0 : index
    %67 = vector.load %arg7[%c28, %c0_54] : memref<36x16xf32, #tpu.memory_space<vmem>>, vector<4x16xf32>
    tpu.vector_store %arg7[%c28, %c0_54], %66 {strides = array<i32>} : memref<36x16xf32, #tpu.memory_space<vmem>>, vector<4x16xf32>,
    %c0_55 = arith.constant 0 : index
    %c1_56 = arith.constant 1 : index
    %c1_57 = arith.constant 1 : index
    %c0_58 = arith.constant 0 : index
    %c0_59 = arith.constant 0 : index
    %68 = vector.load %arg1[%c0_55, %c1_56, %c1_57, %c0_58, %c0_59] : memref<1x4x4x4x16xf32, #tpu.memory_space<vmem>>, vector<1x1x1x4x16xf32>
    %69 = vector.shape_cast %68 : vector<1x1x1x4x16xf32> to vector<4x16xf32>
    %c32 = arith.constant 32 : index
    %c0_60 = arith.constant 0 : index
    %70 = vector.load %arg7[%c32, %c0_60] : memref<36x16xf32, #tpu.memory_space<vmem>>, vector<4x16xf32>
    tpu.vector_store %arg7[%c32, %c0_60], %69 {strides = array<i32>} : memref<36x16xf32, #tpu.memory_space<vmem>>, vector<4x16xf32>,
    %c0_61 = arith.constant 0 : index
    %c0_62 = arith.constant 0 : index
    %71 = vector.load %arg2[%c0_61, %c0_62] : memref<16x36xf32, #tpu.memory_space<vmem>>, vector<16x36xf32>
    %c0_63 = arith.constant 0 : index
    %c0_64 = arith.constant 0 : index
    %72 = vector.load %arg7[%c0_63, %c0_64] : memref<36x16xf32, #tpu.memory_space<vmem>>, vector<36x16xf32>
    %cst_65 = arith.constant dense<0.000000e+00> : vector<16x16xf32>
    %73 = tpu.matmul %71, %72, %cst_65 {dimension_numbers = #tpu.dot_dimension_numbers<[1], [0], [0], [1], [0, 0, 1, 1], [], []>} : vector<16x36xf32>, vector<36x16xf32>, vector<16x16xf32> -> vector<16x16xf32>
    %c0_66 = arith.constant 0 : index
    %c0_67 = arith.constant 0 : index
    %74 = vector.load %arg4[%c0_66, %c0_67] : memref<16x1xf32, #tpu.memory_space<vmem>>, vector<16x1xf32>
    %75 = vector.broadcast %74 : vector<16x1xf32> to vector<16x16xf32>
    %76 = arith.addf %73, %75 : vector<16x16xf32>
    %77 = arith.mulf %76, %76 : vector<16x16xf32>
    %78 = arith.mulf %76, %77 : vector<16x16xf32>
    %cst_68 = arith.constant 4.471500e-02 : f32
    %79 = vector.broadcast %cst_68 : f32 to vector<16x16xf32>
    %80 = arith.mulf %79, %78 : vector<16x16xf32>
    %81 = arith.addf %76, %80 : vector<16x16xf32>
    %cst_69 = arith.constant 0.797884583 : f32
    %82 = vector.broadcast %cst_69 : f32 to vector<16x16xf32>
    %83 = arith.mulf %82, %81 : vector<16x16xf32>
    %84 = math.tanh %83 : vector<16x16xf32>
    %cst_70 = arith.constant 1.000000e+00 : f32
    %85 = vector.broadcast %cst_70 : f32 to vector<16x16xf32>
    %86 = arith.addf %85, %84 : vector<16x16xf32>
    %cst_71 = arith.constant 5.000000e-01 : f32
    %87 = vector.broadcast %cst_71 : f32 to vector<16x16xf32>
    %88 = arith.mulf %87, %86 : vector<16x16xf32>
    %89 = arith.mulf %76, %88 : vector<16x16xf32>
    %c0_72 = arith.constant 0 : index
    %c0_73 = arith.constant 0 : index
    %90 = vector.load %arg7[%c0_72, %c0_73] : memref<36x16xf32, #tpu.memory_space<vmem>>, vector<4x16xf32>
    tpu.vector_store %arg7[%c0_72, %c0_73], %38 {strides = array<i32>} : memref<36x16xf32, #tpu.memory_space<vmem>>, vector<4x16xf32>,
    %c0_74 = arith.constant 0 : index
    %c3_75 = arith.constant 3 : index
    %c2 = arith.constant 2 : index
    %c0_76 = arith.constant 0 : index
    %c0_77 = arith.constant 0 : index
    %91 = vector.load %arg1[%c0_74, %c3_75, %c2, %c0_76, %c0_77] : memref<1x4x4x4x16xf32, #tpu.memory_space<vmem>>, vector<1x1x1x4x16xf32>
    %92 = vector.shape_cast %91 : vector<1x1x1x4x16xf32> to vector<4x16xf32>
    %93 = vector.extract_strided_slice %92 {offsets = [0, 0], sizes = [4, 12], strides = [1, 1]} : vector<4x16xf32> to vector<4x12xf32>
    %94 = tpu.concatenate %31, %93 in 1 : vector<4x4xf32>, vector<4x12xf32> -> vector<4x16xf32>
    %c4_78 = arith.constant 4 : index
    %c0_79 = arith.constant 0 : index
    %95 = vector.load %arg7[%c4_78, %c0_79] : memref<36x16xf32, #tpu.memory_space<vmem>>, vector<4x16xf32>
    tpu.vector_store %arg7[%c4_78, %c0_79], %94 {strides = array<i32>} : memref<36x16xf32, #tpu.memory_space<vmem>>, vector<4x16xf32>,
    %c0_80 = arith.constant 0 : index
    %c3_81 = arith.constant 3 : index
    %c3_82 = arith.constant 3 : index
    %c0_83 = arith.constant 0 : index
    %c0_84 = arith.constant 0 : index
    %96 = vector.load %arg1[%c0_80, %c3_81, %c3_82, %c0_83, %c0_84] : memref<1x4x4x4x16xf32, #tpu.memory_space<vmem>>, vector<1x1x1x4x16xf32>
    %97 = vector.shape_cast %96 : vector<1x1x1x4x16xf32> to vector<4x16xf32>
    %98 = vector.extract_strided_slice %97 {offsets = [0, 0], sizes = [4, 12], strides = [1, 1]} : vector<4x16xf32> to vector<4x12xf32>
    %99 = tpu.concatenate %31, %98 in 1 : vector<4x4xf32>, vector<4x12xf32> -> vector<4x16xf32>
    %c8_85 = arith.constant 8 : index
    %c0_86 = arith.constant 0 : index
    %100 = vector.load %arg7[%c8_85, %c0_86] : memref<36x16xf32, #tpu.memory_space<vmem>>, vector<4x16xf32>
    tpu.vector_store %arg7[%c8_85, %c0_86], %99 {strides = array<i32>} : memref<36x16xf32, #tpu.memory_space<vmem>>, vector<4x16xf32>,
    %c12_87 = arith.constant 12 : index
    %c0_88 = arith.constant 0 : index
    %101 = vector.load %arg7[%c12_87, %c0_88] : memref<36x16xf32, #tpu.memory_space<vmem>>, vector<4x16xf32>
    tpu.vector_store %arg7[%c12_87, %c0_88], %54 {strides = array<i32>} : memref<36x16xf32, #tpu.memory_space<vmem>>, vector<4x16xf32>,
    %c0_89 = arith.constant 0 : index
    %c0_90 = arith.constant 0 : index
    %c2_91 = arith.constant 2 : index
    %c0_92 = arith.constant 0 : index
    %c0_93 = arith.constant 0 : index
    %102 = vector.load %arg1[%c0_89, %c0_90, %c2_91, %c0_92, %c0_93] : memref<1x4x4x4x16xf32, #tpu.memory_space<vmem>>, vector<1x1x1x4x16xf32>
    %103 = vector.shape_cast %102 : vector<1x1x1x4x16xf32> to vector<4x16xf32>
    %c16_94 = arith.constant 16 : index
    %c0_95 = arith.constant 0 : index
    %104 = vector.load %arg7[%c16_94, %c0_95] : memref<36x16xf32, #tpu.memory_space<vmem>>, vector<4x16xf32>
    tpu.vector_store %arg7[%c16_94, %c0_95], %103 {strides = array<i32>} : memref<36x16xf32, #tpu.memory_space<vmem>>, vector<4x16xf32>,
    %c0_96 = arith.constant 0 : index
    %c0_97 = arith.constant 0 : index
    %c3_98 = arith.constant 3 : index
    %c0_99 = arith.constant 0 : index
    %c0_100 = arith.constant 0 : index
    %105 = vector.load %arg1[%c0_96, %c0_97, %c3_98, %c0_99, %c0_100] : memref<1x4x4x4x16xf32, #tpu.memory_space<vmem>>, vector<1x1x1x4x16xf32>
    %106 = vector.shape_cast %105 : vector<1x1x1x4x16xf32> to vector<4x16xf32>
    %c20_101 = arith.constant 20 : index
    %c0_102 = arith.constant 0 : index
    %107 = vector.load %arg7[%c20_101, %c0_102] : memref<36x16xf32, #tpu.memory_space<vmem>>, vector<4x16xf32>
    tpu.vector_store %arg7[%c20_101, %c0_102], %106 {strides = array<i32>} : memref<36x16xf32, #tpu.memory_space<vmem>>, vector<4x16xf32>,
    %c24_103 = arith.constant 24 : index
    %c0_104 = arith.constant 0 : index
    %108 = vector.load %arg7[%c24_103, %c0_104] : memref<36x16xf32, #tpu.memory_space<vmem>>, vector<4x16xf32>
    tpu.vector_store %arg7[%c24_103, %c0_104], %69 {strides = array<i32>} : memref<36x16xf32, #tpu.memory_space<vmem>>, vector<4x16xf32>,
    %c0_105 = arith.constant 0 : index
    %c1_106 = arith.constant 1 : index
    %c2_107 = arith.constant 2 : index
    %c0_108 = arith.constant 0 : index
    %c0_109 = arith.constant 0 : index
    %109 = vector.load %arg1[%c0_105, %c1_106, %c2_107, %c0_108, %c0_109] : memref<1x4x4x4x16xf32, #tpu.memory_space<vmem>>, vector<1x1x1x4x16xf32>
    %110 = vector.shape_cast %109 : vector<1x1x1x4x16xf32> to vector<4x16xf32>
    %c28_110 = arith.constant 28 : index
    %c0_111 = arith.constant 0 : index
    %111 = vector.load %arg7[%c28_110, %c0_111] : memref<36x16xf32, #tpu.memory_space<vmem>>, vector<4x16xf32>
    tpu.vector_store %arg7[%c28_110, %c0_111], %110 {strides = array<i32>} : memref<36x16xf32, #tpu.memory_space<vmem>>, vector<4x16xf32>,
    %c0_112 = arith.constant 0 : index
    %c1_113 = arith.constant 1 : index
    %c3_114 = arith.constant 3 : index
    %c0_115 = arith.constant 0 : index
    %c0_116 = arith.constant 0 : index
    %112 = vector.load %arg1[%c0_112, %c1_113, %c3_114, %c0_115, %c0_116] : memref<1x4x4x4x16xf32, #tpu.memory_space<vmem>>, vector<1x1x1x4x16xf32>
    %113 = vector.shape_cast %112 : vector<1x1x1x4x16xf32> to vector<4x16xf32>
    %c32_117 = arith.constant 32 : index
    %c0_118 = arith.constant 0 : index
    %114 = vector.load %arg7[%c32_117, %c0_118] : memref<36x16xf32, #tpu.memory_space<vmem>>, vector<4x16xf32>
    tpu.vector_store %arg7[%c32_117, %c0_118], %113 {strides = array<i32>} : memref<36x16xf32, #tpu.memory_space<vmem>>, vector<4x16xf32>,
    %c0_119 = arith.constant 0 : index
    %c0_120 = arith.constant 0 : index
    %115 = vector.load %arg2[%c0_119, %c0_120] : memref<16x36xf32, #tpu.memory_space<vmem>>, vector<16x36xf32>
    %c0_121 = arith.constant 0 : index
    %c0_122 = arith.constant 0 : index
    %116 = vector.load %arg7[%c0_121, %c0_122] : memref<36x16xf32, #tpu.memory_space<vmem>>, vector<36x16xf32>
    %cst_123 = arith.constant dense<0.000000e+00> : vector<16x16xf32>
    %117 = tpu.matmul %115, %116, %cst_123 {dimension_numbers = #tpu.dot_dimension_numbers<[1], [0], [0], [1], [0, 0, 1, 1], [], []>} : vector<16x36xf32>, vector<36x16xf32>, vector<16x16xf32> -> vector<16x16xf32>
    %c0_124 = arith.constant 0 : index
    %c0_125 = arith.constant 0 : index
    %118 = vector.load %arg4[%c0_124, %c0_125] : memref<16x1xf32, #tpu.memory_space<vmem>>, vector<16x1xf32>
    %119 = vector.broadcast %118 : vector<16x1xf32> to vector<16x16xf32>
    %120 = arith.addf %117, %119 : vector<16x16xf32>
    %121 = arith.mulf %120, %120 : vector<16x16xf32>
    %122 = arith.mulf %120, %121 : vector<16x16xf32>
    %cst_126 = arith.constant 4.471500e-02 : f32
    %123 = vector.broadcast %cst_126 : f32 to vector<16x16xf32>
    %124 = arith.mulf %123, %122 : vector<16x16xf32>
    %125 = arith.addf %120, %124 : vector<16x16xf32>
    %cst_127 = arith.constant 0.797884583 : f32
    %126 = vector.broadcast %cst_127 : f32 to vector<16x16xf32>
    %127 = arith.mulf %126, %125 : vector<16x16xf32>
    %128 = math.tanh %127 : vector<16x16xf32>
    %cst_128 = arith.constant 1.000000e+00 : f32
    %129 = vector.broadcast %cst_128 : f32 to vector<16x16xf32>
    %130 = arith.addf %129, %128 : vector<16x16xf32>
    %cst_129 = arith.constant 5.000000e-01 : f32
    %131 = vector.broadcast %cst_129 : f32 to vector<16x16xf32>
    %132 = arith.mulf %131, %130 : vector<16x16xf32>
    %133 = arith.mulf %120, %132 : vector<16x16xf32>
    %c0_130 = arith.constant 0 : index
    %c0_131 = arith.constant 0 : index
    %134 = vector.load %arg7[%c0_130, %c0_131] : memref<36x16xf32, #tpu.memory_space<vmem>>, vector<4x16xf32>
    tpu.vector_store %arg7[%c0_130, %c0_131], %63 {strides = array<i32>} : memref<36x16xf32, #tpu.memory_space<vmem>>, vector<4x16xf32>,
    %c4_132 = arith.constant 4 : index
    %c0_133 = arith.constant 0 : index
    %135 = vector.load %arg7[%c4_132, %c0_133] : memref<36x16xf32, #tpu.memory_space<vmem>>, vector<4x16xf32>
    tpu.vector_store %arg7[%c4_132, %c0_133], %66 {strides = array<i32>} : memref<36x16xf32, #tpu.memory_space<vmem>>, vector<4x16xf32>,
    %c8_134 = arith.constant 8 : index
    %c0_135 = arith.constant 0 : index
    %136 = vector.load %arg7[%c8_134, %c0_135] : memref<36x16xf32, #tpu.memory_space<vmem>>, vector<4x16xf32>
    tpu.vector_store %arg7[%c8_134, %c0_135], %69 {strides = array<i32>} : memref<36x16xf32, #tpu.memory_space<vmem>>, vector<4x16xf32>,
    %c0_136 = arith.constant 0 : index
    %c2_137 = arith.constant 2 : index
    %c3_138 = arith.constant 3 : index
    %c0_139 = arith.constant 0 : index
    %c0_140 = arith.constant 0 : index
    %137 = vector.load %arg1[%c0_136, %c2_137, %c3_138, %c0_139, %c0_140] : memref<1x4x4x4x16xf32, #tpu.memory_space<vmem>>, vector<1x1x1x4x16xf32>
    %138 = vector.shape_cast %137 : vector<1x1x1x4x16xf32> to vector<4x16xf32>
    %139 = vector.extract_strided_slice %138 {offsets = [0, 0], sizes = [4, 15], strides = [1, 1]} : vector<4x16xf32> to vector<4x15xf32>
    %140 = tpu.concatenate %42, %139 in 1 : vector<4x1xf32>, vector<4x15xf32> -> vector<4x16xf32>
    %cst_141 = arith.constant 0.000000e+00 : f32
    %141 = vector.broadcast %cst_141 : f32 to vector<4x16xf32>
    %142 = vector.shape_cast %18 : vector<1x16xi1> to vector<1x16xi1>
    %143 = vector.broadcast %142 : vector<1x16xi1> to vector<4x16xi1>
    %144 = arith.select %143, %140, %141 : vector<4x16xi1>, vector<4x16xf32>
    %c12_142 = arith.constant 12 : index
    %c0_143 = arith.constant 0 : index
    %145 = vector.load %arg7[%c12_142, %c0_143] : memref<36x16xf32, #tpu.memory_space<vmem>>, vector<4x16xf32>
    tpu.vector_store %arg7[%c12_142, %c0_143], %144 {strides = array<i32>} : memref<36x16xf32, #tpu.memory_space<vmem>>, vector<4x16xf32>,
    %c0_144 = arith.constant 0 : index
    %c2_145 = arith.constant 2 : index
    %c0_146 = arith.constant 0 : index
    %c0_147 = arith.constant 0 : index
    %c0_148 = arith.constant 0 : index
    %146 = vector.load %arg1[%c0_144, %c2_145, %c0_146, %c0_147, %c0_148] : memref<1x4x4x4x16xf32, #tpu.memory_space<vmem>>, vector<1x1x1x4x16xf32>
    %147 = vector.shape_cast %146 : vector<1x1x1x4x16xf32> to vector<4x16xf32>
    %c16_149 = arith.constant 16 : index
    %c0_150 = arith.constant 0 : index
    %148 = vector.load %arg7[%c16_149, %c0_150] : memref<36x16xf32, #tpu.memory_space<vmem>>, vector<4x16xf32>
    tpu.vector_store %arg7[%c16_149, %c0_150], %147 {strides = array<i32>} : memref<36x16xf32, #tpu.memory_space<vmem>>, vector<4x16xf32>,
    %c0_151 = arith.constant 0 : index
    %c2_152 = arith.constant 2 : index
    %c1_153 = arith.constant 1 : index
    %c0_154 = arith.constant 0 : index
    %c0_155 = arith.constant 0 : index
    %149 = vector.load %arg1[%c0_151, %c2_152, %c1_153, %c0_154, %c0_155] : memref<1x4x4x4x16xf32, #tpu.memory_space<vmem>>, vector<1x1x1x4x16xf32>
    %150 = vector.shape_cast %149 : vector<1x1x1x4x16xf32> to vector<4x16xf32>
    %c20_156 = arith.constant 20 : index
    %c0_157 = arith.constant 0 : index
    %151 = vector.load %arg7[%c20_156, %c0_157] : memref<36x16xf32, #tpu.memory_space<vmem>>, vector<4x16xf32>
    tpu.vector_store %arg7[%c20_156, %c0_157], %150 {strides = array<i32>} : memref<36x16xf32, #tpu.memory_space<vmem>>, vector<4x16xf32>,
    %c0_158 = arith.constant 0 : index
    %c3_159 = arith.constant 3 : index
    %c3_160 = arith.constant 3 : index
    %c0_161 = arith.constant 0 : index
    %c0_162 = arith.constant 0 : index
    %152 = vector.load %arg1[%c0_158, %c3_159, %c3_160, %c0_161, %c0_162] : memref<1x4x4x4x16xf32, #tpu.memory_space<vmem>>, vector<1x1x1x4x16xf32>
    %153 = vector.shape_cast %152 : vector<1x1x1x4x16xf32> to vector<4x16xf32>
    %154 = vector.extract_strided_slice %153 {offsets = [0, 0], sizes = [4, 15], strides = [1, 1]} : vector<4x16xf32> to vector<4x15xf32>
    %155 = tpu.concatenate %42, %154 in 1 : vector<4x1xf32>, vector<4x15xf32> -> vector<4x16xf32>
    %cst_163 = arith.constant 0.000000e+00 : f32
    %156 = vector.broadcast %cst_163 : f32 to vector<4x16xf32>
    %157 = vector.shape_cast %18 : vector<1x16xi1> to vector<1x16xi1>
    %158 = vector.broadcast %157 : vector<1x16xi1> to vector<4x16xi1>
    %159 = arith.select %158, %155, %156 : vector<4x16xi1>, vector<4x16xf32>
    %c24_164 = arith.constant 24 : index
    %c0_165 = arith.constant 0 : index
    %160 = vector.load %arg7[%c24_164, %c0_165] : memref<36x16xf32, #tpu.memory_space<vmem>>, vector<4x16xf32>
    tpu.vector_store %arg7[%c24_164, %c0_165], %159 {strides = array<i32>} : memref<36x16xf32, #tpu.memory_space<vmem>>, vector<4x16xf32>,
    %c0_166 = arith.constant 0 : index
    %c3_167 = arith.constant 3 : index
    %c0_168 = arith.constant 0 : index
    %c0_169 = arith.constant 0 : index
    %c0_170 = arith.constant 0 : index
    %161 = vector.load %arg1[%c0_166, %c3_167, %c0_168, %c0_169, %c0_170] : memref<1x4x4x4x16xf32, #tpu.memory_space<vmem>>, vector<1x1x1x4x16xf32>
    %162 = vector.shape_cast %161 : vector<1x1x1x4x16xf32> to vector<4x16xf32>
    %c28_171 = arith.constant 28 : index
    %c0_172 = arith.constant 0 : index
    %163 = vector.load %arg7[%c28_171, %c0_172] : memref<36x16xf32, #tpu.memory_space<vmem>>, vector<4x16xf32>
    tpu.vector_store %arg7[%c28_171, %c0_172], %162 {strides = array<i32>} : memref<36x16xf32, #tpu.memory_space<vmem>>, vector<4x16xf32>,
    %c0_173 = arith.constant 0 : index
    %c3_174 = arith.constant 3 : index
    %c1_175 = arith.constant 1 : index
    %c0_176 = arith.constant 0 : index
    %c0_177 = arith.constant 0 : index
    %164 = vector.load %arg1[%c0_173, %c3_174, %c1_175, %c0_176, %c0_177] : memref<1x4x4x4x16xf32, #tpu.memory_space<vmem>>, vector<1x1x1x4x16xf32>
    %165 = vector.shape_cast %164 : vector<1x1x1x4x16xf32> to vector<4x16xf32>
    %c32_178 = arith.constant 32 : index
    %c0_179 = arith.constant 0 : index
    %166 = vector.load %arg7[%c32_178, %c0_179] : memref<36x16xf32, #tpu.memory_space<vmem>>, vector<4x16xf32>
    tpu.vector_store %arg7[%c32_178, %c0_179], %165 {strides = array<i32>} : memref<36x16xf32, #tpu.memory_space<vmem>>, vector<4x16xf32>,
    %c0_180 = arith.constant 0 : index
    %c0_181 = arith.constant 0 : index
    %167 = vector.load %arg2[%c0_180, %c0_181] : memref<16x36xf32, #tpu.memory_space<vmem>>, vector<16x36xf32>
    %c0_182 = arith.constant 0 : index
    %c0_183 = arith.constant 0 : index
    %168 = vector.load %arg7[%c0_182, %c0_183] : memref<36x16xf32, #tpu.memory_space<vmem>>, vector<36x16xf32>
    %cst_184 = arith.constant dense<0.000000e+00> : vector<16x16xf32>
    %169 = tpu.matmul %167, %168, %cst_184 {dimension_numbers = #tpu.dot_dimension_numbers<[1], [0], [0], [1], [0, 0, 1, 1], [], []>} : vector<16x36xf32>, vector<36x16xf32>, vector<16x16xf32> -> vector<16x16xf32>
    %c0_185 = arith.constant 0 : index
    %c0_186 = arith.constant 0 : index
    %170 = vector.load %arg4[%c0_185, %c0_186] : memref<16x1xf32, #tpu.memory_space<vmem>>, vector<16x1xf32>
    %171 = vector.broadcast %170 : vector<16x1xf32> to vector<16x16xf32>
    %172 = arith.addf %169, %171 : vector<16x16xf32>
    %173 = arith.mulf %172, %172 : vector<16x16xf32>
    %174 = arith.mulf %172, %173 : vector<16x16xf32>
    %cst_187 = arith.constant 4.471500e-02 : f32
    %175 = vector.broadcast %cst_187 : f32 to vector<16x16xf32>
    %176 = arith.mulf %175, %174 : vector<16x16xf32>
    %177 = arith.addf %172, %176 : vector<16x16xf32>
    %cst_188 = arith.constant 0.797884583 : f32
    %178 = vector.broadcast %cst_188 : f32 to vector<16x16xf32>
    %179 = arith.mulf %178, %177 : vector<16x16xf32>
    %180 = math.tanh %179 : vector<16x16xf32>
    %cst_189 = arith.constant 1.000000e+00 : f32
    %181 = vector.broadcast %cst_189 : f32 to vector<16x16xf32>
    %182 = arith.addf %181, %180 : vector<16x16xf32>
    %cst_190 = arith.constant 5.000000e-01 : f32
    %183 = vector.broadcast %cst_190 : f32 to vector<16x16xf32>
    %184 = arith.mulf %183, %182 : vector<16x16xf32>
    %185 = arith.mulf %172, %184 : vector<16x16xf32>
    %c0_191 = arith.constant 0 : index
    %c0_192 = arith.constant 0 : index
    %186 = vector.load %arg7[%c0_191, %c0_192] : memref<36x16xf32, #tpu.memory_space<vmem>>, vector<4x16xf32>
    tpu.vector_store %arg7[%c0_191, %c0_192], %69 {strides = array<i32>} : memref<36x16xf32, #tpu.memory_space<vmem>>, vector<4x16xf32>,
    %c4_193 = arith.constant 4 : index
    %c0_194 = arith.constant 0 : index
    %187 = vector.load %arg7[%c4_193, %c0_194] : memref<36x16xf32, #tpu.memory_space<vmem>>, vector<4x16xf32>
    tpu.vector_store %arg7[%c4_193, %c0_194], %110 {strides = array<i32>} : memref<36x16xf32, #tpu.memory_space<vmem>>, vector<4x16xf32>,
    %c8_195 = arith.constant 8 : index
    %c0_196 = arith.constant 0 : index
    %188 = vector.load %arg7[%c8_195, %c0_196] : memref<36x16xf32, #tpu.memory_space<vmem>>, vector<4x16xf32>
    tpu.vector_store %arg7[%c8_195, %c0_196], %113 {strides = array<i32>} : memref<36x16xf32, #tpu.memory_space<vmem>>, vector<4x16xf32>,
    %c12_197 = arith.constant 12 : index
    %c0_198 = arith.constant 0 : index
    %189 = vector.load %arg7[%c12_197, %c0_198] : memref<36x16xf32, #tpu.memory_space<vmem>>, vector<4x16xf32>
    tpu.vector_store %arg7[%c12_197, %c0_198], %150 {strides = array<i32>} : memref<36x16xf32, #tpu.memory_space<vmem>>, vector<4x16xf32>,
    %c0_199 = arith.constant 0 : index
    %c2_200 = arith.constant 2 : index
    %c2_201 = arith.constant 2 : index
    %c0_202 = arith.constant 0 : index
    %c0_203 = arith.constant 0 : index
    %190 = vector.load %arg1[%c0_199, %c2_200, %c2_201, %c0_202, %c0_203] : memref<1x4x4x4x16xf32, #tpu.memory_space<vmem>>, vector<1x1x1x4x16xf32>
    %191 = vector.shape_cast %190 : vector<1x1x1x4x16xf32> to vector<4x16xf32>
    %c16_204 = arith.constant 16 : index
    %c0_205 = arith.constant 0 : index
    %192 = vector.load %arg7[%c16_204, %c0_205] : memref<36x16xf32, #tpu.memory_space<vmem>>, vector<4x16xf32>
    tpu.vector_store %arg7[%c16_204, %c0_205], %191 {strides = array<i32>} : memref<36x16xf32, #tpu.memory_space<vmem>>, vector<4x16xf32>,
    %c0_206 = arith.constant 0 : index
    %c2_207 = arith.constant 2 : index
    %c3_208 = arith.constant 3 : index
    %c0_209 = arith.constant 0 : index
    %c0_210 = arith.constant 0 : index
    %193 = vector.load %arg1[%c0_206, %c2_207, %c3_208, %c0_209, %c0_210] : memref<1x4x4x4x16xf32, #tpu.memory_space<vmem>>, vector<1x1x1x4x16xf32>
    %194 = vector.shape_cast %193 : vector<1x1x1x4x16xf32> to vector<4x16xf32>
    %c20_211 = arith.constant 20 : index
    %c0_212 = arith.constant 0 : index
    %195 = vector.load %arg7[%c20_211, %c0_212] : memref<36x16xf32, #tpu.memory_space<vmem>>, vector<4x16xf32>
    tpu.vector_store %arg7[%c20_211, %c0_212], %194 {strides = array<i32>} : memref<36x16xf32, #tpu.memory_space<vmem>>, vector<4x16xf32>,
    %c24_213 = arith.constant 24 : index
    %c0_214 = arith.constant 0 : index
    %196 = vector.load %arg7[%c24_213, %c0_214] : memref<36x16xf32, #tpu.memory_space<vmem>>, vector<4x16xf32>
    tpu.vector_store %arg7[%c24_213, %c0_214], %165 {strides = array<i32>} : memref<36x16xf32, #tpu.memory_space<vmem>>, vector<4x16xf32>,
    %c0_215 = arith.constant 0 : index
    %c3_216 = arith.constant 3 : index
    %c2_217 = arith.constant 2 : index
    %c0_218 = arith.constant 0 : index
    %c0_219 = arith.constant 0 : index
    %197 = vector.load %arg1[%c0_215, %c3_216, %c2_217, %c0_218, %c0_219] : memref<1x4x4x4x16xf32, #tpu.memory_space<vmem>>, vector<1x1x1x4x16xf32>
    %198 = vector.shape_cast %197 : vector<1x1x1x4x16xf32> to vector<4x16xf32>
    %c28_220 = arith.constant 28 : index
    %c0_221 = arith.constant 0 : index
    %199 = vector.load %arg7[%c28_220, %c0_221] : memref<36x16xf32, #tpu.memory_space<vmem>>, vector<4x16xf32>
    tpu.vector_store %arg7[%c28_220, %c0_221], %198 {strides = array<i32>} : memref<36x16xf32, #tpu.memory_space<vmem>>, vector<4x16xf32>,
    %c0_222 = arith.constant 0 : index
    %c3_223 = arith.constant 3 : index
    %c3_224 = arith.constant 3 : index
    %c0_225 = arith.constant 0 : index
    %c0_226 = arith.constant 0 : index
    %200 = vector.load %arg1[%c0_222, %c3_223, %c3_224, %c0_225, %c0_226] : memref<1x4x4x4x16xf32, #tpu.memory_space<vmem>>, vector<1x1x1x4x16xf32>
    %201 = vector.shape_cast %200 : vector<1x1x1x4x16xf32> to vector<4x16xf32>
    %c32_227 = arith.constant 32 : index
    %c0_228 = arith.constant 0 : index
    %202 = vector.load %arg7[%c32_227, %c0_228] : memref<36x16xf32, #tpu.memory_space<vmem>>, vector<4x16xf32>
    tpu.vector_store %arg7[%c32_227, %c0_228], %201 {strides = array<i32>} : memref<36x16xf32, #tpu.memory_space<vmem>>, vector<4x16xf32>,
    %c0_229 = arith.constant 0 : index
    %c0_230 = arith.constant 0 : index
    %203 = vector.load %arg2[%c0_229, %c0_230] : memref<16x36xf32, #tpu.memory_space<vmem>>, vector<16x36xf32>
    %c0_231 = arith.constant 0 : index
    %c0_232 = arith.constant 0 : index
    %204 = vector.load %arg7[%c0_231, %c0_232] : memref<36x16xf32, #tpu.memory_space<vmem>>, vector<36x16xf32>
    %cst_233 = arith.constant dense<0.000000e+00> : vector<16x16xf32>
    %205 = tpu.matmul %203, %204, %cst_233 {dimension_numbers = #tpu.dot_dimension_numbers<[1], [0], [0], [1], [0, 0, 1, 1], [], []>} : vector<16x36xf32>, vector<36x16xf32>, vector<16x16xf32> -> vector<16x16xf32>
    %c0_234 = arith.constant 0 : index
    %c0_235 = arith.constant 0 : index
    %206 = vector.load %arg4[%c0_234, %c0_235] : memref<16x1xf32, #tpu.memory_space<vmem>>, vector<16x1xf32>
    %207 = vector.broadcast %206 : vector<16x1xf32> to vector<16x16xf32>
    %208 = arith.addf %205, %207 : vector<16x16xf32>
    %209 = arith.mulf %208, %208 : vector<16x16xf32>
    %210 = arith.mulf %208, %209 : vector<16x16xf32>
    %cst_236 = arith.constant 4.471500e-02 : f32
    %211 = vector.broadcast %cst_236 : f32 to vector<16x16xf32>
    %212 = arith.mulf %211, %210 : vector<16x16xf32>
    %213 = arith.addf %208, %212 : vector<16x16xf32>
    %cst_237 = arith.constant 0.797884583 : f32
    %214 = vector.broadcast %cst_237 : f32 to vector<16x16xf32>
    %215 = arith.mulf %214, %213 : vector<16x16xf32>
    %216 = math.tanh %215 : vector<16x16xf32>
    %cst_238 = arith.constant 1.000000e+00 : f32
    %217 = vector.broadcast %cst_238 : f32 to vector<16x16xf32>
    %218 = arith.addf %217, %216 : vector<16x16xf32>
    %cst_239 = arith.constant 5.000000e-01 : f32
    %219 = vector.broadcast %cst_239 : f32 to vector<16x16xf32>
    %220 = arith.mulf %219, %218 : vector<16x16xf32>
    %221 = arith.mulf %208, %220 : vector<16x16xf32>
    %cst_240 = arith.constant 0.000000e+00 : f32
    %222 = vector.broadcast %cst_240 : f32 to vector<16x5xf32>
    %223 = vector.extract_strided_slice %221 {offsets = [0, 0], sizes = [16, 11], strides = [1, 1]} : vector<16x16xf32> to vector<16x11xf32>
    %224 = tpu.concatenate %222, %223 in 1 : vector<16x5xf32>, vector<16x11xf32> -> vector<16x16xf32>
    %cst_241 = arith.constant 0.000000e+00 : f32
    %225 = vector.broadcast %cst_241 : f32 to vector<16x16xf32>
    %226 = vector.shape_cast %18 : vector<1x16xi1> to vector<1x16xi1>
    %227 = vector.broadcast %226 : vector<1x16xi1> to vector<16x16xi1>
    %228 = arith.select %227, %224, %225 : vector<16x16xi1>, vector<16x16xf32>
    %c0_242 = arith.constant 0 : index
    %c0_243 = arith.constant 0 : index
    %229 = vector.load %arg8[%c0_242, %c0_243] : memref<144x16xf32, #tpu.memory_space<vmem>>, vector<16x16xf32>
    tpu.vector_store %arg8[%c0_242, %c0_243], %228 {strides = array<i32>} : memref<144x16xf32, #tpu.memory_space<vmem>>, vector<16x16xf32>,
    %cst_244 = arith.constant 0.000000e+00 : f32
    %230 = vector.broadcast %cst_244 : f32 to vector<16x4xf32>
    %231 = vector.extract_strided_slice %185 {offsets = [0, 0], sizes = [16, 12], strides = [1, 1]} : vector<16x16xf32> to vector<16x12xf32>
    %232 = tpu.concatenate %230, %231 in 1 : vector<16x4xf32>, vector<16x12xf32> -> vector<16x16xf32>
    %c16_245 = arith.constant 16 : index
    %c0_246 = arith.constant 0 : index
    %233 = vector.load %arg8[%c16_245, %c0_246] : memref<144x16xf32, #tpu.memory_space<vmem>>, vector<16x16xf32>
    tpu.vector_store %arg8[%c16_245, %c0_246], %232 {strides = array<i32>} : memref<144x16xf32, #tpu.memory_space<vmem>>, vector<16x16xf32>,
    %234 = vector.extract_strided_slice %221 {offsets = [0, 0], sizes = [16, 12], strides = [1, 1]} : vector<16x16xf32> to vector<16x12xf32>
    %235 = tpu.concatenate %230, %234 in 1 : vector<16x4xf32>, vector<16x12xf32> -> vector<16x16xf32>
    %c32_247 = arith.constant 32 : index
    %c0_248 = arith.constant 0 : index
    %236 = vector.load %arg8[%c32_247, %c0_248] : memref<144x16xf32, #tpu.memory_space<vmem>>, vector<16x16xf32>
    tpu.vector_store %arg8[%c32_247, %c0_248], %235 {strides = array<i32>} : memref<144x16xf32, #tpu.memory_space<vmem>>, vector<16x16xf32>,
    %cst_249 = arith.constant 0.000000e+00 : f32
    %237 = vector.broadcast %cst_249 : f32 to vector<16x1xf32>
    %238 = vector.extract_strided_slice %133 {offsets = [0, 0], sizes = [16, 15], strides = [1, 1]} : vector<16x16xf32> to vector<16x15xf32>
    %239 = tpu.concatenate %237, %238 in 1 : vector<16x1xf32>, vector<16x15xf32> -> vector<16x16xf32>
    %cst_250 = arith.constant 0.000000e+00 : f32
    %240 = vector.broadcast %cst_250 : f32 to vector<16x16xf32>
    %241 = vector.shape_cast %18 : vector<1x16xi1> to vector<1x16xi1>
    %242 = vector.broadcast %241 : vector<1x16xi1> to vector<16x16xi1>
    %243 = arith.select %242, %239, %240 : vector<16x16xi1>, vector<16x16xf32>
    %c48 = arith.constant 48 : index
    %c0_251 = arith.constant 0 : index
    %244 = vector.load %arg8[%c48, %c0_251] : memref<144x16xf32, #tpu.memory_space<vmem>>, vector<16x16xf32>
    tpu.vector_store %arg8[%c48, %c0_251], %243 {strides = array<i32>} : memref<144x16xf32, #tpu.memory_space<vmem>>, vector<16x16xf32>,
    %c64 = arith.constant 64 : index
    %c0_252 = arith.constant 0 : index
    %245 = vector.load %arg8[%c64, %c0_252] : memref<144x16xf32, #tpu.memory_space<vmem>>, vector<16x16xf32>
    tpu.vector_store %arg8[%c64, %c0_252], %89 {strides = array<i32>} : memref<144x16xf32, #tpu.memory_space<vmem>>, vector<16x16xf32>,
    %c80 = arith.constant 80 : index
    %c0_253 = arith.constant 0 : index
    %246 = vector.load %arg8[%c80, %c0_253] : memref<144x16xf32, #tpu.memory_space<vmem>>, vector<16x16xf32>
    tpu.vector_store %arg8[%c80, %c0_253], %133 {strides = array<i32>} : memref<144x16xf32, #tpu.memory_space<vmem>>, vector<16x16xf32>,
    %247 = vector.extract_strided_slice %221 {offsets = [0, 0], sizes = [16, 15], strides = [1, 1]} : vector<16x16xf32> to vector<16x15xf32>
    %248 = tpu.concatenate %237, %247 in 1 : vector<16x1xf32>, vector<16x15xf32> -> vector<16x16xf32>
    %cst_254 = arith.constant 0.000000e+00 : f32
    %249 = vector.broadcast %cst_254 : f32 to vector<16x16xf32>
    %250 = vector.shape_cast %18 : vector<1x16xi1> to vector<1x16xi1>
    %251 = vector.broadcast %250 : vector<1x16xi1> to vector<16x16xi1>
    %252 = arith.select %251, %248, %249 : vector<16x16xi1>, vector<16x16xf32>
    %c96 = arith.constant 96 : index
    %c0_255 = arith.constant 0 : index
    %253 = vector.load %arg8[%c96, %c0_255] : memref<144x16xf32, #tpu.memory_space<vmem>>, vector<16x16xf32>
    tpu.vector_store %arg8[%c96, %c0_255], %252 {strides = array<i32>} : memref<144x16xf32, #tpu.memory_space<vmem>>, vector<16x16xf32>,
    %c112 = arith.constant 112 : index
    %c0_256 = arith.constant 0 : index
    %254 = vector.load %arg8[%c112, %c0_256] : memref<144x16xf32, #tpu.memory_space<vmem>>, vector<16x16xf32>
    tpu.vector_store %arg8[%c112, %c0_256], %185 {strides = array<i32>} : memref<144x16xf32, #tpu.memory_space<vmem>>, vector<16x16xf32>,
    %c128 = arith.constant 128 : index
    %c0_257 = arith.constant 0 : index
    %255 = vector.load %arg8[%c128, %c0_257] : memref<144x16xf32, #tpu.memory_space<vmem>>, vector<16x16xf32>
    tpu.vector_store %arg8[%c128, %c0_257], %221 {strides = array<i32>} : memref<144x16xf32, #tpu.memory_space<vmem>>, vector<16x16xf32>,
    %c0_258 = arith.constant 0 : index
    %c0_259 = arith.constant 0 : index
    %256 = vector.load %arg3[%c0_258, %c0_259] : memref<32x144xf32, #tpu.memory_space<vmem>>, vector<32x144xf32>
    %c0_260 = arith.constant 0 : index
    %c0_261 = arith.constant 0 : index
    %257 = vector.load %arg8[%c0_260, %c0_261] : memref<144x16xf32, #tpu.memory_space<vmem>>, vector<144x16xf32>
    %cst_262 = arith.constant dense<0.000000e+00> : vector<32x16xf32>
    %258 = tpu.matmul %256, %257, %cst_262 {dimension_numbers = #tpu.dot_dimension_numbers<[1], [0], [0], [1], [0, 0, 1, 1], [], []>} : vector<32x144xf32>, vector<144x16xf32>, vector<32x16xf32> -> vector<32x16xf32>
    %c0_263 = arith.constant 0 : index
    %c0_264 = arith.constant 0 : index
    %259 = vector.load %arg5[%c0_263, %c0_264] : memref<32x1xf32, #tpu.memory_space<vmem>>, vector<32x1xf32>
    %260 = vector.broadcast %259 : vector<32x1xf32> to vector<32x16xf32>
    %261 = arith.addf %258, %260 : vector<32x16xf32>
    %c0_265 = arith.constant 0 : index
    %c0_266 = arith.constant 0 : index
    %c0_267 = arith.constant 0 : index
    %262 = vector.load %arg6[%c0_265, %c0_266, %c0_267] : memref<1x32x16xf32, #tpu.memory_space<vmem>>, vector<1x32x16xf32>
    %263 = vector.shape_cast %262 : vector<1x32x16xf32> to vector<32x16xf32>
    %264 = vector.shape_cast %261 : vector<32x16xf32> to vector<1x32x16xf32>
    tpu.vector_store %arg6[%c0_265, %c0_266, %c0_267], %264 {strides = array<i32>} : memref<1x32x16xf32, #tpu.memory_space<vmem>>, vector<1x32x16xf32>,
    return
  }
  func.func @transform_0(%arg0: i32) -> (i32, i32, i32, i32, i32) {
    %c0_i32 = arith.constant 0 : i32
    %c0_i32_0 = arith.constant 0 : i32
    %c0_i32_1 = arith.constant 0 : i32
    %c0_i32_2 = arith.constant 0 : i32
    %c0_i32_3 = arith.constant 0 : i32
    return %arg0, %c0_i32, %c0_i32_0, %c0_i32_1, %c0_i32_2 : i32, i32, i32, i32, i32
  }
  func.func @transform_1(%arg0: i32) -> (i32, i32) {
    %c0_i32 = arith.constant 0 : i32
    %c0_i32_0 = arith.constant 0 : i32
    %c0_i32_1 = arith.constant 0 : i32
    return %c0_i32, %c0_i32_0 : i32, i32
  }
  func.func @transform_2(%arg0: i32) -> (i32, i32) {
    %c0_i32 = arith.constant 0 : i32
    %c0_i32_0 = arith.constant 0 : i32
    %c0_i32_1 = arith.constant 0 : i32
    return %c0_i32, %c0_i32_0 : i32, i32
  }
  func.func @transform_3(%arg0: i32) -> (i32, i32) {
    %c0_i32 = arith.constant 0 : i32
    %c0_i32_0 = arith.constant 0 : i32
    %c0_i32_1 = arith.constant 0 : i32
    return %c0_i32, %c0_i32_0 : i32, i32
  }
  func.func @transform_4(%arg0: i32) -> (i32, i32) {
    %c0_i32 = arith.constant 0 : i32
    %c0_i32_0 = arith.constant 0 : i32
    %c0_i32_1 = arith.constant 0 : i32
    return %c0_i32, %c0_i32_0 : i32, i32
  }
  func.func @transform_5(%arg0: i32) -> (i32, i32, i32) {
    %c0_i32 = arith.constant 0 : i32
    %c0_i32_0 = arith.constant 0 : i32
    %c0_i32_1 = arith.constant 0 : i32
    return %arg0, %c0_i32, %c0_i32_0 : i32, i32, i32
  }
}

</mosaic_0001>

<bundles_post_ra>
// kernel: stem_forward.1
= control target key start
LH: loop header
LB: loop body
LE: loop exit
PB: predicated region body
PF: predicated region fallthrough
CT: control target
= control target key end

     0   :  { %s1401_s18 = smov 0   ;;  %s1704_s0 = inlined_call_operand.vmem [shape: f32[2,4,4,4,16], index: 0, kind: input, shape index: {}]   ;;  %s1705_s1 = inlined_call_operand.vmem [shape: f32[16,36], index: 1, kind: input, shape index: {}]   ;;  %s1706_s2 = inlined_call_operand.vmem [shape: f32[32,144], index: 2, kind: input, shape index: {}]   ;;  %s1707_s3 = inlined_call_operand.vmem [shape: f32[16,1], index: 3, kind: input, shape index: {}]   ;;  %s1708_s4 = inlined_call_operand.vmem [shape: f32[32,1], index: 4, kind: input, shape index: {}]   ;;  %s1709_s5 = inlined_call_operand.vmem [shape: f32[2,32,16], index: 5, kind: output, shape index: {}]  }
   0x1 LB: > { %s1135_s19 = sadd.s32 4294967295, %s1364_s18   ;;  %p1139_p0 = scmp.ge.s32.totalorder %s1364_s18, 1  ;;  %s1364_s18 = sphi %s1401_s18, %s15_s18  }
   0x2   : > { %p187_p1 = scmp.lt.s32.totalorder %s1364_s18, 3 }
   0x4   : > { %p188_p2 = pnand %p1139_p0, %p187_p1 }
   0x5   : > { %p215_p3 = scmp.lt.s32.totalorder (!%p188_p2), %s1135_s19, 1  ;;  %s1366_s24 = smov (!%p188_p2), 5   ;;  %vm251_vm0 = vcmask (!%p188_p2), 125952   ;;  %v1462_v17 = vld [vmem:[%s1705_s1] sm:$0xff] (!%p188_p2)  ;;  %vm319_vm1 = vcmask (!%p188_p2), 293888   ;;  %v610_v30 = vld [vmem:[%s1707_s3 + $0x8] sm:$0xff] (!%p188_p2)  ;;  %v225_v32 = vlaneseq (!%p188_p2) }
   0x6   : > { %191 = sbr.rel (%p188_p2) target bundleno = 819 (0x333), region = 40  ;;  %s1367_s25 = smov (!%p188_p2), 4   ;;  %1226 = vmatprep.mubr.msk.f32.mxu1 (!%p188_p2), %vm319_vm1, %v1462_v17  ;;  %v744_v29 = vld [vmem:[%s1707_s3] sm:$0xff] (!%p188_p2)  ;;  %v1369_v31 = vmov (!%p188_p2), 0   ;;  %vm246_vm2 = vcmask (!%p188_p2), 39936   ;;  %vm259_vm3 = vcmask (!%p188_p2), 31744  }
   0x7   : > { %s1368_s26 = smov (!%p188_p2), 1   ;;  %1340 = vset.pattern.permute.xlu1 (!%p188_p2), %v1369_v31  ;;  %1341 = vset.pattern.permute.xlu0 (!%p188_p2), %v1369_v31  ;;  %v226_v33 = vand.u32 (!%p188_p2), 127, %v225_v32  ;;  %vm276_vm5 = vcmask (!%p188_p2), 7168   ;;  %vm326_vm6 = vcmask (!%p188_p2), 1043456   ;;  %vm870_vm7 = vcmask (!%p188_p2), 130048  }
   0x9   : > { %v231_v34 = vand.u32 (!%p188_p2), 3, %v226_v33 }
   0xb   : > { %vm1504_vm4 = vcmp.ne.s32.totalorder (!%p188_p2), %v231_v34, 0 }
   0xd   : > { %s1713_s19 = smov (!%p215_p3, %s1135_s19), 1 }
   0xe   : > { %s1186_s20 = sshll.u32 %s1713_s19, 6  ;;  %s1187_s11 = sshll.u32 %s1713_s19, 5 }
   0xf   : > { %s1415_s23 = scalar_lea.vmem %s1704_s0, %s1186_s20  ;;  %s224_s14 = scalar_lea.vmem %s1709_s5, %s1187_s11 }
  0x10   : > { %v1144_v0 = vld [vmem:[%s1415_s23 + $0x3c] sm:$0xf]  ;;  %v1145_v1 = vld [vmem:[%s1415_s23 + $0x30] sm:$0xf]  ;;  %v1147_v2 = vld [vmem:[%s1415_s23 + $0xc] sm:$0xf] }
  0x11   : > { %243 = vrot.lane.b32.xlu0 %v1144_v0, %s1366_s24  ;;  %256 = vrot.lane.b32.xlu1 %v1145_v1, %s1367_s25  ;;  %v1146_v3 = vld [vmem:[%s1415_s23 + $0x34] sm:$0xf]  ;;  %v1424_v4 = vld [vmem:[%s1415_s23 + $0x10] sm:$0xf] }
  0x12   : > { %v1427_v5 = vld [vmem:[%s1415_s23 + $0x14] sm:$0xf]  ;;  %296 = vst.msk [vmem:[#allocation2 + $0x1c] sm:$0xf] %vm251_vm0, %v1424_v4  ;;  %v1434_v6 = vld [vmem:[%s1415_s23 + $0x4] sm:$0xf] }
  0x13   : > { %299 = vst.msk [vmem:[#allocation2 + $0x20] sm:$0xf] %vm251_vm0, %v1427_v5  ;;  %v280_v7 = vld [vmem:[%s1415_s23] sm:$0xf]  ;;  %284 = vst.msk [vmem:[#allocation2 + $0x14] sm:$0xf] %vm251_vm0, %v1434_v6 }
  0x14   : > { %281 = vst.msk [vmem:[#allocation2 + $0x10] sm:$0xf] %vm251_vm0, %v280_v7  ;;  %v1149_v8 = vld [vmem:[%s1415_s23 + $0x1c] sm:$0xf]  ;;  %v1155_v9 = vld [vmem:[%s1415_s23 + $0x38] sm:$0xf] }
  0x15   : > { %273 = vrot.lane.b32.xlu0 %v1147_v2, %s1368_s26  ;;  %265 = vrot.lane.b32.xlu1 %v1146_v3, %s1367_s25  ;;  %v1156_v10 = vld [vmem:[%s1415_s23 + $0x3c] sm:$0xf]  ;;  %v1164_v11 = vld [vmem:[%s1415_s23 + $0x2c] sm:$0xf] }
  0x16   : > { %v1449_v12 = vld [vmem:[%s1415_s23 + $0x1c] sm:$0xf]  ;;  %v1157_v13 = vld [vmem:[%s1415_s23 + $0x8] sm:$0xf]  ;;  %v1158_v14 = vld [vmem:[%s1415_s23 + $0xc] sm:$0xf] }
  0x17   : > { %v1167_v18 = vld [vmem:[%s1415_s23 + $0x3c] sm:$0xf]  ;;  %v1165_v19 = vld [vmem:[%s1415_s23 + $0x20] sm:$0xf]  ;;  %v1474_v20 = vld [vmem:[%s1415_s23 + $0x24] sm:$0xf] }
  0x18   : > { %v1481_v23 = vld [vmem:[%s1415_s23 + $0x34] sm:$0xf]  ;;  %v1173_v24 = vld [vmem:[%s1415_s23 + $0x28] sm:$0xf]  ;;  %v1174_v25 = vld [vmem:[%s1415_s23 + $0x2c] sm:$0xf] }
  0x19   : > { %288 = vrot.lane.b32.xlu0 %v1149_v8, %s1368_s26  ;;  %427 = vrot.lane.b32.xlu1 %v1155_v9, %s1367_s25  ;;  %v1176_v28 = vld [vmem:[%s1415_s23 + $0x3c] sm:$0xf]  ;;  %v1159_v57 = vld [vmem:[%s1415_s23 + $0x18] sm:$0xf] }
  0x1a   : > { %v1453_v15 = vld [vmem:[#allocation2 + $0x20] sm:$0xf]  ;;  %v301_v2 = vld [vmem:[%s1705_s1 + $0x8] sm:$0xff]  ;;  %v1168_v3 = vld [vmem:[%s1415_s23 + $0x30] sm:$0xf] }
  0x1b   : > { %v1455_v16 = vld [vmem:[#allocation2 + $0x10] sm:$0xff]  ;;  %450 = vst.msk [vmem:[#allocation2 + $0x20] sm:$0xf] %vm251_vm0, %v1449_v12 }
  0x1c   : > { %442 = vst.msk [vmem:[#allocation2 + $0x10] sm:$0xf] %vm251_vm0, %v1157_v13  ;;  %444 = vst.msk [vmem:[#allocation2 + $0x14] sm:$0xf] %vm251_vm0, %v1158_v14 }
  0x1d   : > { %434 = vrot.lane.b32.xlu0 %v1156_v10, %s1367_s25  ;;  %578 = vrot.lane.b32.xlu1 %v1164_v11, %s1368_s26  ;;  %v1175_v11 = vld [vmem:[%s1415_s23 + $0x38] sm:$0xf] }
  0x21   : > { %592 = vrot.lane.b32.xlu0 %v1167_v18, %s1368_s26  ;;  %748 = vperm.xlu1 %1340, %v744_v29  }
  0x22   : > { %v1478_v22 = vld [vmem:[#allocation2 + $0x20] sm:$0xf] }
  0x23   : > { %v1476_v21 = vld [vmem:[#allocation2 + $0x10] sm:$0xff]  ;;  %601 = vst.msk [vmem:[#allocation2 + $0x20] sm:$0xf] %vm251_vm0, %v1481_v23 }
  0x24   : > { %586 = vst.msk [vmem:[#allocation2 + $0x10] sm:$0xf] %vm251_vm0, %v1165_v19  ;;  %589 = vst.msk [vmem:[#allocation2 + $0x14] sm:$0xf] %vm251_vm0, %v1474_v20 }
  0x25   : > { %753 = vperm.xlu0 %1341, %v610_v30   ;;  %613 = vperm.xlu1 %1340, %v744_v29  }
  0x29   : > { %462 = vperm.xlu0 %1341, %v744_v29   ;;  %618 = vperm.xlu1 %1340, %v610_v30  }
  0x2a   : > { %v1494_v27 = vld [vmem:[#allocation2 + $0x20] sm:$0xf] }
  0x2b   : > { %v1490_v26 = vld [vmem:[#allocation2 + $0x10] sm:$0xff]  ;;  %736 = vst.msk [vmem:[#allocation2 + $0x20] sm:$0xf] %vm251_vm0, %v1176_v28 }
  0x2c   : > { %729 = vst.msk [vmem:[#allocation2 + $0x10] sm:$0xf] %vm251_vm0, %v1173_v24  ;;  %731 = vst.msk [vmem:[#allocation2 + $0x14] sm:$0xf] %vm251_vm0, %v1174_v25 }
  0x2d   : > { %311 = vperm.xlu0 %1341, %v744_v29   ;;  %467 = vperm.xlu1 %1340, %v610_v30  }
  0x31   : > { %316 = vperm.xlu1 %1340, %v610_v30  }
  0x83   : > { %v244_v36 = vpop.permute.xlu0 %243  ;;  %v257_v37 = vpop.permute.xlu1 %256 }
  0x84   : > { %v247_v38 = vsel %vm246_vm2, 0.0, %v244_v36  ;;  %v260_v39 = vsel %vm259_vm3, 0.0, %v257_v37 }
  0x85   : > { %v250_v40 = vsel %vm1504_vm4, %v247_v38, 0.0  ;;  %261 = vst.msk [vmem:[#allocation2 + $0x4] sm:$0xf] %vm251_vm0, %v260_v39 }
  0x86   : > { %252 = vst.msk [vmem:[#allocation2] sm:$0xf] %vm251_vm0, %v250_v40 }
  0x87   : > { %v274_v41 = vpop.permute.xlu0 %273  ;;  %v266_v42 = vpop.permute.xlu1 %265 }
  0x88   : > { %v277_v43 = vsel %vm276_vm5, 0.0, %v274_v41  ;;  %v268_v44 = vsel %vm259_vm3, 0.0, %v266_v42 }
  0x89   : > { %v278_v45 = vsel %vm1504_vm4, %v277_v43, 0.0  ;;  %269 = vst.msk [vmem:[#allocation2 + $0x8] sm:$0xf] %vm251_vm0, %v268_v44 }
  0x8a   : > { %279 = vst.msk [vmem:[#allocation2 + $0xc] sm:$0xf] %vm251_vm0, %v278_v45 }
  0x8b   : > { %v289_v46 = vpop.permute.xlu0 %288  ;;  %v428_v47 = vpop.permute.xlu1 %427 }
  0x8c   : > { %v291_v48 = vsel %vm276_vm5, 0.0, %v289_v46  ;;  %v430_v49 = vsel %vm259_vm3, 0.0, %v428_v47 }
  0x8d   : > { %v302_v50 = vld [vmem:[#allocation2] sm:$0xff]  ;;  %v292_v51 = vsel %vm1504_vm4, %v291_v48, 0.0 }
  0x8e   : > { %423 = vst.msk [vmem:[#allocation2] sm:$0xf] %vm251_vm0, %v268_v44  ;;  %293 = vst.msk [vmem:[#allocation2 + $0x18] sm:$0xf] %vm251_vm0, %v292_v51 }
  0x8f   : > { %431 = vst.msk [vmem:[#allocation2 + $0x4] sm:$0xf] %vm251_vm0, %v430_v49  ;;  %v435_v52 = vpop.permute.xlu0 %434  ;;  %v579_v55 = vpop.permute.xlu1 %578 }
  0x90   : > { %v437_v53 = vsel %vm259_vm3, 0.0, %v435_v52  ;;  %v581_v58 = vsel %vm276_vm5, 0.0, %v579_v55 }
  0x91   : > { %v303_v54 = vld [vmem:[#allocation2 + $0x8] sm:$0xff]  ;;  %v582_v63 = vsel %vm1504_vm4, %v581_v58, 0.0 }
  0x92   : > { %438 = vst.msk [vmem:[#allocation2 + $0x8] sm:$0xf] %vm251_vm0, %v437_v53  ;;  %v1268_v56 = vpack.c.bf16 %v303_v54, %v302_v50  ;;  %439 = vst.msk [vmem:[#allocation2 + $0xc] sm:$0xf] %vm251_vm0, %v1434_v6 }
  0x93   : > { %v593_v61 = vpop.permute.xlu0 %592 }
  0x94   : > { %1269 = vmatprep.subr.bf16.mxu1 %v1268_v56  ;;  %v595_v0 = vsel %vm276_vm5, 0.0, %v593_v61 }
  0x95   : > { %v305_v59 = vld [vmem:[#allocation2 + $0x18] sm:$0xff]  ;;  %1271 = vmatpush3.bf16.msra.mxu1 %v1268_v56 }
  0x96   : > { %v453_v60 = vld [vmem:[#allocation2] sm:$0xff]  ;;  %445 = vst.msk [vmem:[#allocation2 + $0x18] sm:$0xf] %vm251_vm0, %v1427_v5  ;;  %v1272_v62 = vpack.c.bf16 %v305_v59, %v1455_v16  ;;  %448 = vst.msk [vmem:[#allocation2 + $0x1c] sm:$0xf] %vm251_vm0, %v1159_v57  ;;  %v741_v16 = vld [vmem:[#allocation2 + $0x10] sm:$0xff] }
  0x97   : > { %572 = vst.msk [vmem:[#allocation2] sm:$0xf] %vm251_vm0, %v292_v51  ;;  %573 = vst.msk [vmem:[#allocation2 + $0x4] sm:$0xf] %vm251_vm0, %v1424_v4  ;;  %v596_v4 = vsel %vm1504_vm4, %v595_v0, 0.0 }
  0x98   : > { %1273 = vmatprep.subr.bf16.mxu1 %v1272_v62 }
  0x99   : > { %v454_v1 = vld [vmem:[#allocation2 + $0x8] sm:$0xff]  ;;  %1275 = vmatpush3.bf16.msra.mxu1 %v1272_v62 }
  0x9a   : > { %574 = vst.msk [vmem:[#allocation2 + $0x8] sm:$0xf] %vm251_vm0, %v1427_v5  ;;  %583 = vst.msk [vmem:[#allocation2 + $0xc] sm:$0xf] %vm251_vm0, %v582_v63  ;;  %1224 = vmatprep.subr.msk.mxu1 %vm326_vm6, %v1453_v15  ;;  %v1276_v6 = vpack.c.bf16 %v454_v1, %v453_v60 }
  0x9d   : > { %1225 = vmatpush3.msk.msra.mxu1 %vm326_vm6, %v1453_v15  ;;  %v456_v7 = vld [vmem:[#allocation2 + $0x18] sm:$0xff] }
  0x9e   : > { %v604_v8 = vld [vmem:[#allocation2] sm:$0xff]  ;;  %1227 = vmatmul.mubr.msk.f32.vlgmr.msra.gmra.mrb[0].mxu1 %vm319_vm1, %v301_v2  ;;  %1277 = vmatprep.subr.bf16.mxu1 %v1276_v6  ;;  %599 = vst.msk [vmem:[#allocation2 + $0x1c] sm:$0xf] %vm251_vm0, %v1168_v3  ;;  %597 = vst.msk [vmem:[#allocation2 + $0x18] sm:$0xf] %vm251_vm0, %v596_v4  ;;  %v1280_v9 = vpack.c.bf16 %v456_v7, %v1476_v21 }
  0x9f   : > { %723 = vst.msk [vmem:[#allocation2] sm:$0xf] %vm251_vm0, %v1427_v5  ;;  %724 = vst.msk [vmem:[#allocation2 + $0x4] sm:$0xf] %vm251_vm0, %v1159_v57  ;;  %1279 = vmatpush3.bf16.msra.mxu1 %v1276_v6  ;;  %1239 = vmatprep.mubr.msk.f32.mxu1 %vm319_vm1, %v1462_v17  ;;  %v743_v21 = vld [vmem:[#allocation2 + $0x20] sm:$0xf] }
  0xa0   : > { %1281 = vmatprep.subr.bf16.mxu1 %v1280_v9 }
  0xa1   : > { %v605_v10 = vld [vmem:[#allocation2 + $0x8] sm:$0xff] }
  0xa2   : > { %725 = vst.msk [vmem:[#allocation2 + $0x8] sm:$0xf] %vm251_vm0, %v1449_v12  ;;  %726 = vst.msk [vmem:[#allocation2 + $0xc] sm:$0xf] %vm251_vm0, %v1474_v20  ;;  %v1284_v13 = vpack.c.bf16 %v605_v10, %v604_v8 }
  0xa3   : > { %1283 = vmatpush3.bf16.msra.mxu1 %v1280_v9 }
  0xa4   : > { %1237 = vmatprep.subr.msk.mxu1 %vm326_vm6, %v1478_v22  ;;  %v754_v25 = vpop.permute.xlu0 %753 }
  0xa5   : > { %v607_v5 = vld [vmem:[#allocation2 + $0x18] sm:$0xff] }
  0xa6   : > { %v1288_v14 = vpack.c.bf16 %v607_v5, %v1490_v26  ;;  %732 = vst.msk [vmem:[#allocation2 + $0x18] sm:$0xf] %vm251_vm0, %v1481_v23  ;;  %734 = vst.msk [vmem:[#allocation2 + $0x1c] sm:$0xf] %vm251_vm0, %v1175_v11  ;;  %v739_v12 = vld [vmem:[#allocation2] sm:$0xff] }
  0xa7   : > { %1238 = vmatpush3.msk.msra.mxu1 %vm326_vm6, %v1478_v22  ;;  %v1591_v22 = vpop.permute.xlu1 %748 }
  0xa8   : > { %1240 = vmatmul.mubr.msk.f32.vlgmr.msra.gmra.mrb[2].mxu1 %vm319_vm1, %v301_v2  ;;  %1285 = vmatprep.subr.bf16.mxu1 %v1284_v13 }
  0xa9   : > { %1287 = vmatpush3.bf16.msra.mxu1 %v1284_v13  ;;  %1252 = vmatprep.mubr.msk.f32.mxu1 %vm319_vm1, %v1462_v17  ;;  %v740_v15 = vld [vmem:[#allocation2 + $0x8] sm:$0xff] }
  0xaa   : > { %1289 = vmatprep.subr.bf16.mxu1 %v1288_v14  ;;  %v1292_v19 = vpack.c.bf16 %v740_v15, %v739_v12 }
  0xab   : > { %v614_v23 = vpop.permute.xlu1 %613 }
  0xad   : > { %1291 = vmatpush3.bf16.msra.mxu1 %v1288_v14  ;;  %v742_v18 = vld [vmem:[#allocation2 + $0x18] sm:$0xff] }
  0xae   : > { %1250 = vmatprep.subr.msk.mxu1 %vm326_vm6, %v1494_v27  ;;  %v1296_v20 = vpack.c.bf16 %v742_v18, %v741_v16 }
  0xaf   : > { %v619_v24 = vpop.permute.xlu1 %618 }
  0xb1   : > { %1251 = vmatpush3.msk.msra.mxu1 %vm326_vm6, %v1494_v27  ;;  %v463_v27 = vpop.permute.xlu0 %462 }
  0xb2   : > { %1253 = vmatmul.mubr.msk.f32.vlgmr.msra.gmra.mrb[4].mxu1 %vm319_vm1, %v301_v2  ;;  %1293 = vmatprep.subr.bf16.mxu1 %v1292_v19 }
  0xb3   : > { %1295 = vmatpush3.bf16.msra.mxu1 %v1292_v19  ;;  %1265 = vmatprep.mubr.msk.f32.mxu1 %vm319_vm1, %v1462_v17  ;;  %v468_v26 = vpop.permute.xlu1 %467 }
  0xb4   : > { %1297 = vmatprep.subr.bf16.mxu1 %v1296_v20 }
  0xb5   : > { %v312_v29 = vpop.permute.xlu0 %311 }
  0xb7   : > { %1299 = vmatpush3.bf16.msra.mxu1 %v1296_v20  ;;  %v317_v28 = vpop.permute.xlu1 %316 }
  0xb8   : > { %1263 = vmatprep.subr.msk.mxu1 %vm326_vm6, %v743_v21 }
  0xbb   : > { %1264 = vmatpush3.msk.msra.mxu1 %vm326_vm6, %v743_v21 }
  0xbc   : > { %1266 = vmatmul.mubr.msk.f32.vlgmr.msra.gmra.mrb[6].mxu1 %vm319_vm1, %v301_v2 }
 0x171   : > { %v1228_v30 = vpop.f32.mrb[0].mxu1 }
 0x172   : > { %v402_v17 = vadd.f32 %v1228_v30, %v317_v28  ;;  %v396_v31 = vpop.f32.mrb[1].mxu1 }
 0x173   : > { %v397_v32 = vadd.f32 %v396_v31, %v312_v29 }
 0x174   : > { %v406_v33 = vmul.f32 %v402_v17, %v402_v17 }
 0x175   : > { %v405_v34 = vmul.f32 %v397_v32, %v397_v32 }
 0x176   : > { %v408_v36 = vmul.f32 %v406_v33, %v402_v17 }
 0x177   : > { %v407_v37 = vmul.f32 %v405_v34, %v397_v32 }
 0x178   : > { %v410_v38 = vmul.f32 0.044715, %v408_v36 }
 0x179   : > { %v409_v39 = vmul.f32 0.044715, %v407_v37 }
 0x17a   : > { %v412_v40 = vadd.f32 %v410_v38, %v402_v17 }
 0x17b   : > { %v411_v41 = vadd.f32 %v409_v39, %v397_v32  ;;  %v1241_v42 = vpop.f32.mrb[2].mxu1 }
 0x17c   : > { %v414_v43 = vmul.f32 0.7978846, %v412_v40  ;;  %v551_v44 = vadd.f32 %v1241_v42, %v468_v26  ;;  %v545_v45 = vpop.f32.mrb[3].mxu1 }
 0x17d   : > { %v413_v46 = vmul.f32 0.7978846, %v411_v41  ;;  %v546_v47 = vadd.f32 %v545_v45, %v463_v27 }
 0x17e   : > { %1342 = vtanh.f32 %v414_v43  ;;  %v555_v48 = vmul.f32 %v551_v44, %v551_v44 }
 0x17f   : > { %1344 = vtanh.f32 %v413_v46  ;;  %v554_v49 = vmul.f32 %v546_v47, %v546_v47 }
 0x180   : > { %v557_v50 = vmul.f32 %v555_v48, %v551_v44 }
 0x181   : > { %v556_v51 = vmul.f32 %v554_v49, %v546_v47 }
 0x182   : > { %v559_v52 = vmul.f32 0.044715, %v557_v50 }
 0x183   : > { %v558_v53 = vmul.f32 0.044715, %v556_v51 }
 0x184   : > { %v561_v54 = vadd.f32 %v559_v52, %v551_v44 }
 0x185   : > { %v560_v55 = vadd.f32 %v558_v53, %v546_v47  ;;  %v1254_v56 = vpop.f32.mrb[4].mxu1 }
 0x186   : > { %v563_v57 = vmul.f32 0.7978846, %v561_v54  ;;  %v702_v58 = vadd.f32 %v1254_v56, %v619_v24  ;;  %v696_v59 = vpop.f32.mrb[5].mxu1  ;;  %v956_v56 = vld [vmem:[%s1708_s4 + $0x8] sm:$0xff] }
 0x187   : > { %v562_v60 = vmul.f32 0.7978846, %v560_v55  ;;  %v697_v61 = vadd.f32 %v696_v59, %v614_v23  ;;  %v1370_v55 = vmov 0.0|0.0   ;;  %v957_v59 = vld [vmem:[%s1708_s4 + $0x10] sm:$0xff] }
 0x188   : > { %v1343_v62 = vpop.eup %1342  ;;  %v706_v63 = vmul.f32 %v702_v58, %v702_v58  ;;  %1346 = vtanh.f32 %v563_v57  ;;  %1300 = vmatprep.subr.bf16.mxu0 %v1370_v55  ;;  %v955_v57 = vld [vmem:[%s1708_s4] sm:$0xff] }
 0x189   : > { %v1345_v0 = vpop.eup %1344  ;;  %v418_v1 = vadd.f32 1.0, %v1343_v62  ;;  %v705_v2 = vmul.f32 %v697_v61, %v697_v61  ;;  %1348 = vtanh.f32 %v562_v60  ;;  %v930_v60 = vld [vmem:[%s1706_s2 + $0x8] sm:$0xff] }
 0x18a   : > { %v417_v3 = vadd.f32 1.0, %v1345_v0  ;;  %v708_v4 = vmul.f32 %v706_v63, %v702_v58  ;;  %1180 = vmatprep.mubr.msk.f32.mxu0 %vm870_vm7, %v930_v60 }
 0x18b   : > { %v420_v6 = vmul.f32 0.5, %v418_v1  ;;  %v707_v7 = vmul.f32 %v705_v2, %v697_v61 }
 0x18c   : > { %v419_v8 = vmul.f32 0.5, %v417_v3  ;;  %v710_v9 = vmul.f32 0.044715, %v708_v4 }
 0x18d   : > { %v422_v10 = vmul.f32 %v420_v6, %v402_v17  ;;  %v709_v11 = vmul.f32 0.044715, %v707_v7 }
 0x18e   : > { %v421_v5 = vmul.f32 %v419_v8, %v397_v32  ;;  %v712_v13 = vadd.f32 %v710_v9, %v702_v58 }
 0x18f   : > { %910 = vst.msk [vmem:[#allocation3 + $0x48] sm:$0xff] %vm870_vm7, %v422_v10  ;;  %v711_v14 = vadd.f32 %v709_v11, %v697_v61  ;;  %v1267_v12 = vpop.f32.mrb[6].mxu1 }
 0x190   : > { %909 = vst.msk [vmem:[#allocation3 + $0x40] sm:$0xff] %vm870_vm7, %v421_v5  ;;  %v714_v15 = vmul.f32 0.7978846, %v712_v13  ;;  %v837_v16 = vadd.f32 %v1267_v12, %v754_v25  ;;  %v831_v18 = vpop.f32.mrb[7].mxu1 }
 0x191   : > { %v713_v19 = vmul.f32 0.7978846, %v711_v14  ;;  %v832_v20 = vadd.f32 %v831_v18, %v1591_v22 }
 0x192   : > { %v1347_v21 = vpop.eup %1346  ;;  %v841_v23 = vmul.f32 %v837_v16, %v837_v16  ;;  %1350 = vtanh.f32 %v714_v15 }
 0x193   : > { %v1349_v24 = vpop.eup %1348  ;;  %v840_v26 = vmul.f32 %v832_v20, %v832_v20  ;;  %1352 = vtanh.f32 %v713_v19  ;;  %v567_v27 = vadd.f32 1.0, %v1347_v21 }
 0x194   : > { %v843_v28 = vmul.f32 %v841_v23, %v837_v16  ;;  %v566_v29 = vadd.f32 1.0, %v1349_v24 }
 0x195   : > { %v842_v30 = vmul.f32 %v840_v26, %v832_v20  ;;  %v569_v17 = vmul.f32 0.5, %v567_v27 }
 0x196   : > { %v845_v31 = vmul.f32 0.044715, %v843_v28  ;;  %v568_v32 = vmul.f32 0.5, %v566_v29 }
 0x197   : > { %v844_v33 = vmul.f32 0.044715, %v842_v30  ;;  %v571_v34 = vmul.f32 %v569_v17, %v551_v44 }
 0x198   : > { %v847_v25 = vadd.f32 %v845_v31, %v837_v16  ;;  %v570_v36 = vmul.f32 %v568_v32, %v546_v47 }
 0x199   : > { %v846_v37 = vadd.f32 %v844_v33, %v832_v20  ;;  %912 = vst.msk [vmem:[#allocation3 + $0x58] sm:$0xff] %vm870_vm7, %v571_v34 }
 0x19a   : > { %v849_v22 = vmul.f32 0.7978846, %v847_v25  ;;  %911 = vst.msk [vmem:[#allocation3 + $0x50] sm:$0xff] %vm870_vm7, %v570_v36 }
 0x19b   : > { %v848_v38 = vmul.f32 0.7978846, %v846_v37  ;;  %v945_v37 = vld [vmem:[#allocation3 + $0x40] sm:$0xff] }
 0x19c   : > { %v1351_v39 = vpop.eup %1350  ;;  %1354 = vtanh.f32 %v849_v22  ;;  %v946_v22 = vld [vmem:[#allocation3 + $0x48] sm:$0xff] }
 0x19d   : > { %v1353_v40 = vpop.eup %1352  ;;  %1356 = vtanh.f32 %v848_v38  ;;  %v718_v41 = vadd.f32 1.0, %v1351_v39  ;;  %v1313_v38 = vpack.c.bf16 %v946_v22, %v945_v37 }
 0x19e   : > { %v717_v42 = vadd.f32 1.0, %v1353_v40 }
 0x19f   : > { %v720_v43 = vmul.f32 0.5, %v718_v41 }
 0x1a0   : > { %v719_v45 = vmul.f32 0.5, %v717_v42  ;;  %v948_v35 = vld [vmem:[#allocation3 + $0x58] sm:$0xff] }
 0x1a1   : > { %v722_v46 = vmul.f32 %v720_v43, %v702_v58  ;;  %v958_v58 = vld [vmem:[%s1708_s4 + $0x18] sm:$0xff] }
 0x1a2   : > { %v721_v48 = vmul.f32 %v719_v45, %v697_v61  ;;  %v947_v39 = vld [vmem:[#allocation3 + $0x50] sm:$0xff] }
 0x1a3   : > { %926 = vst.msk [vmem:[#allocation3 + $0x78] sm:$0xff] %vm870_vm7, %v722_v46  ;;  %v1316_v40 = vpack.c.bf16 %v948_v35, %v947_v39 }
 0x1a4   : > { %925 = vst.msk [vmem:[#allocation3 + $0x70] sm:$0xff] %vm870_vm7, %v721_v48 }
 0x1a6   : > { %v1355_v44 = vpop.eup %1354 }
 0x1a7   : > { %v1357_v47 = vpop.eup %1356  ;;  %v853_v49 = vadd.f32 1.0, %v1355_v44 }
 0x1a8   : > { %v852_v50 = vadd.f32 1.0, %v1357_v47 }
 0x1a9   : > { %v855_v51 = vmul.f32 0.5, %v853_v49 }
 0x1aa   : > { %v854_v52 = vmul.f32 0.5, %v852_v50  ;;  %v929_v50 = vld [vmem:[%s1706_s2] sm:$0xff] }
 0x1ab   : > { %v857_v53 = vmul.f32 %v855_v51, %v837_v16  ;;  %v951_v45 = vld [vmem:[#allocation3 + $0x70] sm:$0xff] }
 0x1ac   : > { %v856_v54 = vmul.f32 %v854_v52, %v832_v20  ;;  %v932_v51 = vld [vmem:[%s1706_s2 + $0x18] sm:$0xff]  ;;  %v931_v52 = vld [vmem:[%s1706_s2 + $0x10] sm:$0xff] }
 0x1ad   : > { %862 = vrot.lane.b32.xlu1 %v857_v53, %s1366_s24  ;;  %928 = vst.msk [vmem:[#allocation3 + $0x88] sm:$0xff] %vm870_vm7, %v857_v53 }
 0x1ae   : > { %860 = vrot.lane.b32.xlu0 %v856_v54, %s1366_s24  ;;  %927 = vst.msk [vmem:[#allocation3 + $0x80] sm:$0xff] %vm870_vm7, %v856_v54 }
 0x1b1   : > { %877 = vrot.lane.b32.xlu1 %v722_v46, %s1367_s25  ;;  %v952_v46 = vld [vmem:[#allocation3 + $0x78] sm:$0xff] }
 0x1b2   : > { %875 = vrot.lane.b32.xlu0 %v721_v48, %s1367_s25  ;;  %v1322_v48 = vpack.c.bf16 %v952_v46, %v951_v45 }
 0x1b4   : > { %v954_v47 = vld [vmem:[#allocation3 + $0x88] sm:$0xff] }
 0x1b5   : > { %887 = vrot.lane.b32.xlu1 %v857_v53, %s1367_s25  ;;  %v953_v44 = vld [vmem:[#allocation3 + $0x80] sm:$0xff] }
 0x1b6   : > { %885 = vrot.lane.b32.xlu0 %v856_v54, %s1367_s25  ;;  %v1325_v49 = vpack.c.bf16 %v954_v47, %v953_v44 }
 0x1b9   : > { %899 = vrot.lane.b32.xlu1 %v571_v34, %s1368_s26 }
 0x1ba   : > { %897 = vrot.lane.b32.xlu0 %v570_v36, %s1368_s26 }
 0x1bd   : > { %915 = vrot.lane.b32.xlu1 %v857_v53, %s1368_s26  ;;  %v934_v53 = vld [vmem:[%s1706_s2 + $0x28] sm:$0xff] }
 0x1be   : > { %913 = vrot.lane.b32.xlu0 %v856_v54, %s1368_s26  ;;  %v933_v54 = vld [vmem:[%s1706_s2 + $0x20] sm:$0xff] }
 0x1c1   : > { %966 = vperm.xlu1 %1340, %v956_v56   ;;  %v935_v56 = vld [vmem:[%s1706_s2 + $0x30] sm:$0xff] }
 0x1c2   : > { %961 = vperm.xlu0 %1341, %v955_v57  }
 0x1c5   : > { %976 = vperm.xlu1 %1340, %v958_v58  }
 0x1c6   : > { %971 = vperm.xlu0 %1341, %v957_v59  }
 0x21f   : > { %v863_v61 = vpop.permute.xlu1 %862 }
 0x220   : > { %v867_v62 = vsel %vm246_vm2, 0.0, %v863_v61  ;;  %v861_v63 = vpop.permute.xlu0 %860 }
 0x221   : > { %v869_v0 = vsel %vm1504_vm4, %v867_v62, 0.0  ;;  %v866_v1 = vsel %vm246_vm2, 0.0, %v861_v63 }
 0x222   : > { %872 = vst.msk [vmem:[#allocation3 + $0x8] sm:$0xff] %vm870_vm7, %v869_v0  ;;  %v868_v2 = vsel %vm1504_vm4, %v866_v1, 0.0 }
 0x223   : > { %871 = vst.msk [vmem:[#allocation3] sm:$0xff] %vm870_vm7, %v868_v2  ;;  %v878_v3 = vpop.permute.xlu1 %877 }
 0x224   : > { %v882_v4 = vsel %vm259_vm3, 0.0, %v878_v3  ;;  %v876_v6 = vpop.permute.xlu0 %875 }
 0x225   : > { %884 = vst.msk [vmem:[#allocation3 + $0x18] sm:$0xff] %vm870_vm7, %v882_v4  ;;  %v881_v7 = vsel %vm259_vm3, 0.0, %v876_v6 }
 0x226   : > { %883 = vst.msk [vmem:[#allocation3 + $0x10] sm:$0xff] %vm870_vm7, %v881_v7 }
 0x227   : > { %v888_v8 = vpop.permute.xlu1 %887 }
 0x228   : > { %v892_v9 = vsel %vm259_vm3, 0.0, %v888_v8  ;;  %v886_v10 = vpop.permute.xlu0 %885 }
 0x229   : > { %894 = vst.msk [vmem:[#allocation3 + $0x28] sm:$0xff] %vm870_vm7, %v892_v9  ;;  %v891_v11 = vsel %vm259_vm3, 0.0, %v886_v10  ;;  %v938_v5 = vld [vmem:[#allocation3 + $0x8] sm:$0xff] }
 0x22a   : > { %893 = vst.msk [vmem:[#allocation3 + $0x20] sm:$0xff] %vm870_vm7, %v891_v11  ;;  %v937_v13 = vld [vmem:[#allocation3] sm:$0xff] }
 0x22b   : > { %v900_v14 = vpop.permute.xlu1 %899  ;;  %v1301_v12 = vpack.c.bf16 %v938_v5, %v937_v13 }
 0x22c   : > { %v904_v15 = vsel %vm276_vm5, 0.0, %v900_v14  ;;  %v898_v16 = vpop.permute.xlu0 %897  ;;  %v940_v18 = vld [vmem:[#allocation3 + $0x18] sm:$0xff] }
 0x22d   : > { %v906_v19 = vsel %vm1504_vm4, %v904_v15, 0.0  ;;  %v903_v20 = vsel %vm276_vm5, 0.0, %v898_v16  ;;  %1302 = vmatpush1.bf16.msra.mxu0 %v1301_v12  ;;  %v939_v21 = vld [vmem:[#allocation3 + $0x10] sm:$0xff] }
 0x22e   : > { %908 = vst.msk [vmem:[#allocation3 + $0x38] sm:$0xff] %vm870_vm7, %v906_v19  ;;  %v905_v23 = vsel %vm1504_vm4, %v903_v20, 0.0  ;;  %1303 = vmatprep.subr.bf16.mxu0 %v1370_v55  ;;  %v1304_v24 = vpack.c.bf16 %v940_v18, %v939_v21 }
 0x22f   : > { %907 = vst.msk [vmem:[#allocation3 + $0x30] sm:$0xff] %vm870_vm7, %v905_v23  ;;  %v916_v26 = vpop.permute.xlu1 %915 }
 0x230   : > { %v920_v27 = vsel %vm276_vm5, 0.0, %v916_v26  ;;  %v914_v28 = vpop.permute.xlu0 %913  ;;  %v942_v29 = vld [vmem:[#allocation3 + $0x28] sm:$0xff] }
 0x231   : > { %v922_v30 = vsel %vm1504_vm4, %v920_v27, 0.0  ;;  %v919_v17 = vsel %vm276_vm5, 0.0, %v914_v28  ;;  %1305 = vmatpush1.bf16.msra.mxu0 %v1304_v24  ;;  %v941_v31 = vld [vmem:[#allocation3 + $0x20] sm:$0xff] }
 0x232   : > { %924 = vst.msk [vmem:[#allocation3 + $0x68] sm:$0xff] %vm870_vm7, %v922_v30  ;;  %v921_v32 = vsel %vm1504_vm4, %v919_v17, 0.0  ;;  %1306 = vmatprep.subr.bf16.mxu0 %v1370_v55  ;;  %v1307_v33 = vpack.c.bf16 %v942_v29, %v941_v31 }
 0x233   : > { %923 = vst.msk [vmem:[#allocation3 + $0x60] sm:$0xff] %vm870_vm7, %v921_v32 }
 0x235   : > { %1308 = vmatpush1.bf16.msra.mxu0 %v1307_v33  ;;  %v944_v34 = vld [vmem:[#allocation3 + $0x38] sm:$0xff] }
 0x236   : > { %1309 = vmatprep.subr.bf16.mxu0 %v1370_v55  ;;  %v943_v25 = vld [vmem:[#allocation3 + $0x30] sm:$0xff] }
 0x237   : > { %v1310_v36 = vpack.c.bf16 %v944_v34, %v943_v25 }
 0x239   : > { %1311 = vmatpush1.bf16.msra.mxu0 %v1310_v36  ;;  %v950_v42 = vld [vmem:[#allocation3 + $0x68] sm:$0xff] }
 0x23a   : > { %1312 = vmatprep.subr.bf16.mxu0 %v1370_v55  ;;  %v949_v41 = vld [vmem:[#allocation3 + $0x60] sm:$0xff] }
 0x23b   : > { %v1319_v43 = vpack.c.bf16 %v950_v42, %v949_v41 }
 0x23d   : > { %1314 = vmatpush1.bf16.msra.mxu0 %v1313_v38 }
 0x23e   : > { %1315 = vmatprep.subr.bf16.mxu0 %v1370_v55 }
 0x240   : > { %v967_v61 = vpop.permute.xlu1 %966 }
 0x241   : > { %1317 = vmatpush1.bf16.msra.mxu0 %v1316_v40  ;;  %v962_v57 = vpop.permute.xlu0 %961 }
 0x242   : > { %1318 = vmatprep.subr.bf16.mxu0 %v1370_v55 }
 0x244   : > { %v977_v6 = vpop.permute.xlu1 %976 }
 0x245   : > { %1320 = vmatpush1.bf16.msra.mxu0 %v1319_v43  ;;  %v972_v1 = vpop.permute.xlu0 %971 }
 0x246   : > { %1321 = vmatprep.subr.bf16.mxu0 %v1370_v55 }
 0x249   : > { %1323 = vmatpush1.bf16.msra.mxu0 %v1322_v48 }
 0x24a   : > { %1324 = vmatprep.subr.bf16.mxu0 %v1370_v55  ;;  %v936_v55 = vld [vmem:[%s1706_s2 + $0x38] sm:$0xff] }
 0x24d   : > { %1326 = vmatpush1.bf16.msra.mxu0 %v1325_v49 }
 0x250   : > { %1056 = vmatmul.mubr.f32.vlgmr.msra.gmra.mrb[0].mxu0 %v929_v50 }
 0x251   : > { %1181 = vmatprep.mubr.msk.f32.mxu0 %vm870_vm7, %v932_v51 }
 0x254   : > { %1061 = vmatmul.mubr.f32.gmra.mrb[2].mxu0 %v931_v52 }
 0x255   : > { %1182 = vmatprep.mubr.msk.f32.mxu0 %vm870_vm7, %v934_v53 }
 0x258   : > { %1066 = vmatmul.mubr.f32.gmra.mrb[4].mxu0 %v933_v54 }
 0x259   : > { %1183 = vmatprep.mubr.msk.f32.mxu0 %vm870_vm7, %v936_v55 }
 0x25c   : > { %1071 = vmatmul.mubr.f32.gmra.mrb[6].mxu0 %v935_v56 }
 0x323   : > { %v1057_v58 = vpop.f32.mrb[0].mxu0 }
 0x324   : > { %v1058_v59 = vadd.f32 %v1057_v58, %v962_v57  ;;  %v1059_v60 = vpop.f32.mrb[1].mxu0 }
 0x326   : > { %1076 = vst.msk [vmem:[%s224_s14] sm:$0xff] %vm870_vm7, %v1058_v59 }
 0x327   : > { %v1062_v62 = vpop.f32.mrb[2].mxu0 }
 0x328   : > { %v1063_v63 = vadd.f32 %v1062_v62, %v967_v61  ;;  %v1064_v0 = vpop.f32.mrb[3].mxu0 }
 0x32a   : > { %1077 = vst.msk [vmem:[%s224_s14 + $0x8] sm:$0xff] %vm870_vm7, %v1063_v63 }
 0x32b   : > { %v1067_v2 = vpop.f32.mrb[4].mxu0 }
 0x32c   : > { %v1068_v3 = vadd.f32 %v1067_v2, %v972_v1  ;;  %v1069_v4 = vpop.f32.mrb[5].mxu0 }
 0x32e   : > { %1078 = vst.msk [vmem:[%s224_s14 + $0x10] sm:$0xff] %vm870_vm7, %v1068_v3 }
 0x32f   : > { %v1072_v7 = vpop.f32.mrb[6].mxu0 }
 0x330   : > { %v1073_v8 = vadd.f32 %v1072_v7, %v977_v6  ;;  %v1074_v9 = vpop.f32.mrb[7].mxu0 }
 0x332   : > { %1079 = vst.msk [vmem:[%s224_s14 + $0x18] sm:$0xff] %vm870_vm7, %v1073_v8 }
 0x333 PF: > { %s15_s18 = sadd.s32 1, %s1364_s18  }
 0x334   : > { %p12_p4 = scmp.ge.s32.totalorder %s15_s18, 4  }
 0x336   :  { %14 = sbr.rel (!%p12_p4) target bundleno = 1 (0x1), region = 85 }

</bundles_post_ra>
